<compile_context>
chip_gen: v5e
topology: v5e:2x2
jax: 0.10.0
libtpu: 0.0.40
codegen_flags: <defaults>
</compile_context>

<pallas_src>
import functools

import jax
import jax.numpy as jnp
from jax import lax
from jax.experimental import pallas as pl
from jax.experimental.pallas import tpu as pltpu

EPS = 1e-5                       # nn.BatchNorm2d default eps
LANE = 128                       # TPU lane width
_VMEM_LIMIT = 32 * 1024 * 1024   # safe on v5e/v6e/v7x; per-step working set is tiny


# ------------------------------- kernels -----------------------------------------

def _conv_mm_kernel(p_ref, w_ref, o_ref, mom_ref):
    """One M-tile of conv-as-matmul with fused per-channel moment accumulation.

    p_ref:   (TM, KP)  im2col patches (zero-padded along K)
    w_ref:   (KP, CP)  packed 3x3 weights (zero-padded)
    o_ref:   (TM, CP)  conv output tile (lane-dense)
    mom_ref: (8,  CP)  row 0 = sum, row 1 = sum of squares (grid accumulator)
    """
    i = pl.program_id(0)

    o = jnp.dot(p_ref[...], w_ref[...], preferred_element_type=jnp.float32)
    o_ref[...] = o

    cp = o.shape[1]
    s = jnp.sum(o, axis=0, keepdims=True)              # (1, CP)
    sq = jnp.sum(o * o, axis=0, keepdims=True)         # (1, CP)

    # Build the full (8, CP) update with pure elementwise ops (no concat):
    rows = lax.broadcasted_iota(jnp.int32, (8, cp), 0)
    upd = jnp.where(rows == 0, jnp.broadcast_to(s, (8, cp)),
                    jnp.where(rows == 1, jnp.broadcast_to(sq, (8, cp)), 0.0))

    @pl.when(i == 0)
    def _():
        mom_ref[...] = jnp.zeros_like(mom_ref)

    mom_ref[...] += upd


def _bn_relu_kernel(o_ref, mom_ref, gb_ref, y_ref, *, inv_count):
    """y = relu(bn(o)) using fused batch moments (E[x^2]-E[x]^2 form)."""
    mean = mom_ref[0:1, :] * inv_count
    var = jnp.maximum(mom_ref[1:2, :] * inv_count - mean * mean, 0.0)
    scale = gb_ref[0:1, :] * lax.rsqrt(var + EPS)
    shift = gb_ref[1:2, :] - mean * scale
    y_ref[...] = jnp.maximum(o_ref[...] * scale + shift, 0.0)


def _bn_add_relu_kernel(o_ref, r_ref, mom_ref, gb_ref, y_ref, *, inv_count):
    """y = relu(bn(o) + residual)."""
    mean = mom_ref[0:1, :] * inv_count
    var = jnp.maximum(mom_ref[1:2, :] * inv_count - mean * mean, 0.0)
    scale = gb_ref[0:1, :] * lax.rsqrt(var + EPS)
    shift = gb_ref[1:2, :] - mean * scale
    y_ref[...] = jnp.maximum(o_ref[...] * scale + shift + r_ref[...], 0.0)


# --------------------------- pallas_call wrappers ---------------------------------

def _conv_mm(patches, wmat, tm):
    M, kp = patches.shape
    cp = wmat.shape[1]
    return pl.pallas_call(
        _conv_mm_kernel,
        out_shape=(jax.ShapeDtypeStruct((M, cp), jnp.float32),
                   jax.ShapeDtypeStruct((8, cp), jnp.float32)),
        grid=(M // tm,),
        in_specs=[pl.BlockSpec((tm, kp), lambda i: (i, 0)),
                  pl.BlockSpec((kp, cp), lambda i: (0, 0))],
        out_specs=(pl.BlockSpec((tm, cp), lambda i: (i, 0)),
                   pl.BlockSpec((8, cp), lambda i: (0, 0))),
        compiler_params=pltpu.CompilerParams(
            dimension_semantics=("arbitrary",),      # moments reduce over this axis
            vmem_limit_bytes=_VMEM_LIMIT),
    )(patches, wmat)


def _bn_relu(o, mom, gb, tm, inv_count):
    M, cp = o.shape
    return pl.pallas_call(
        functools.partial(_bn_relu_kernel, inv_count=inv_count),
        out_shape=jax.ShapeDtypeStruct((M, cp), jnp.float32),
        grid=(M // tm,),
        in_specs=[pl.BlockSpec((tm, cp), lambda i: (i, 0)),
                  pl.BlockSpec((8, cp), lambda i: (0, 0)),
                  pl.BlockSpec((8, cp), lambda i: (0, 0))],
        out_specs=pl.BlockSpec((tm, cp), lambda i: (i, 0)),
        compiler_params=pltpu.CompilerParams(
            dimension_semantics=("parallel",),
            vmem_limit_bytes=_VMEM_LIMIT),
    )(o, mom, gb)


def _bn_add_relu(o, resid, mom, gb, tm, inv_count):
    M, cp = o.shape
    return pl.pallas_call(
        functools.partial(_bn_add_relu_kernel, inv_count=inv_count),
        out_shape=jax.ShapeDtypeStruct((M, cp), jnp.float32),
        grid=(M // tm,),
        in_specs=[pl.BlockSpec((tm, cp), lambda i: (i, 0)),
                  pl.BlockSpec((tm, cp), lambda i: (i, 0)),
                  pl.BlockSpec((8, cp), lambda i: (0, 0)),
                  pl.BlockSpec((8, cp), lambda i: (0, 0))],
        out_specs=pl.BlockSpec((tm, cp), lambda i: (i, 0)),
        compiler_params=pltpu.CompilerParams(
            dimension_semantics=("parallel",),
            vmem_limit_bytes=_VMEM_LIMIT),
    )(o, resid, mom, gb)


# --------------------------- layout plumbing (XLA) ---------------------------------

def _round_up(v, m):
    return (v + m - 1) // m * m


def _pick_tile(M):
    """Largest row tile that still gives >= 2 grid steps (so DMA pipelines)."""
    for tm in (1024, 512, 256, 128, 64, 32, 16, 8):
        if M % tm == 0 and M // tm >= 2:
            return tm
    return M


def _im2col_3x3(x_nhwc):
    """(N,H,W,C) -> (N*H*W, 9*C) patches; (kh,kw)-major, channel-minor columns.
    # TODO(synk): for very large inputs build patches inside the conv kernel from
    # a row-haloed tile to avoid the 9x HBM blow-up of materialized patches."""
    N, H, W, C = x_nhwc.shape
    xp = jnp.pad(x_nhwc, ((0, 0), (1, 1), (1, 1), (0, 0)))
    cols = [xp[:, kh:kh + H, kw:kw + W, :] for kh in range(3) for kw in range(3)]
    return jnp.concatenate(cols, axis=-1).reshape(N * H * W, 9 * C)


def _pad_last(a, target):
    pad = target - a.shape[-1]
    return a if pad == 0 else jnp.pad(a, ((0, 0), (0, pad)))


def _pack_weight(w_oihw, kp, cp):
    """(Cout,Cin,3,3) OIHW -> (kp, cp) matmul weight matching the im2col order."""
    cout, cin, _, _ = w_oihw.shape
    wm = jnp.transpose(w_oihw, (2, 3, 1, 0)).reshape(9 * cin, cout)
    return jnp.pad(wm, ((0, kp - 9 * cin), (0, cp - cout))).astype(jnp.float32)


def _pack_affine(gamma, beta, cp):
    """gamma/beta -> (8, cp): row 0 = gamma, row 1 = beta (padding lanes stay 0)."""
    c = gamma.shape[0]
    arr = jnp.zeros((8, cp), jnp.float32)
    arr = arr.at[0, :c].set(gamma.astype(jnp.float32))
    arr = arr.at[1, :c].set(beta.astype(jnp.float32))
    return arr


def basic_block(x_nchw, params):
    """Forward of _BasicBlock (stride=1, downsample=None, training-mode BN).
    x_nchw: (N,C,H,W) f32; params: (w1,g1,b1,w2,g2,b2), w*: OIHW, g*/b*: (C,)."""
    w1, g1, b1, w2, g2, b2 = params
    N, cin, H, W = x_nchw.shape
    cout = w1.shape[0]
    assert cin == cout, "identity residual requires inplanes == planes"

    M = N * H * W
    cp = _round_up(cout, LANE)
    kp1 = _round_up(9 * cin, LANE)
    kp2 = _round_up(9 * cout, LANE)
    tm = _pick_tile(M)
    inv_count = 1.0 / M

    x_nhwc = jnp.transpose(x_nchw, (0, 2, 3, 1)).astype(jnp.float32)
    resid = _pad_last(x_nhwc.reshape(M, cin), cp)        # lane-dense residual slab

    # conv1 (+ fused batch moments) -> bn1 + relu
    p1 = _pad_last(_im2col_3x3(x_nhwc), kp1)
    o1, mom1 = _conv_mm(p1, _pack_weight(w1, kp1, cp), tm)
    y1 = _bn_relu(o1, mom1, _pack_affine(g1, b1, cp), tm, inv_count)

    # conv2 (+ fused batch moments) -> bn2 + residual add + relu
    y1_nhwc = y1[:, :cout].reshape(N, H, W, cout)
    p2 = _pad_last(_im2col_3x3(y1_nhwc), kp2)
    o2, mom2 = _conv_mm(p2, _pack_weight(w2, kp2, cp), tm)
    out = _bn_add_relu(o2, resid, mom2, _pack_affine(g2, b2, cp), tm, inv_count)

    out_nhwc = out[:, :cout].reshape(N, H, W, cout)
    return jnp.transpose(out_nhwc, (0, 3, 1, 2))         # back to NCHW


# -------------------------------- reference --------------------------------------

def _ref_basic_block(x, w1, g1, b1, w2, g2, b2):
    dn = lax.conv_dimension_numbers(x.shape, w1.shape, ('NCHW', 'OIHW', 'NCHW'))

    def bn(o, g, b):
        m = o.mean(axis=(0, 2, 3), keepdims=True)
        v = ((o - m) ** 2).mean(axis=(0, 2, 3), keepdims=True)
        return (o - m) * lax.rsqrt(v + EPS) * g.reshape(1, -1, 1, 1) + b.reshape(1, -1, 1, 1)

    o = lax.conv_general_dilated(x, w1, (1, 1), ((1, 1), (1, 1)), dimension_numbers=dn)
    o = jnp.maximum(bn(o, g1, b1), 0.0)
    o = lax.conv_general_dilated(o, w2, (1, 1), ((1, 1), (1, 1)), dimension_numbers=dn)
    o = bn(o, g2, b2)
    return jnp.maximum(o + x, 0.0)


# ----------------------------------- main ----------------------------------------

if __name__ == "__main__":
    key = jax.random.PRNGKey(0)
    N, C, H, W = 2, 4, 16, 16  # inplanes == planes == 4, stride=1
    ks = jax.random.split(key, 7)

    x = jax.random.normal(ks[0], (N, C, H, W), jnp.float32)
    w1 = 0.2 * jax.random.normal(ks[1], (C, C, 3, 3), jnp.float32)
    g1 = 1.0 + 0.1 * jax.random.normal(ks[2], (C,), jnp.float32)
    b1 = 0.1 * jax.random.normal(ks[3], (C,), jnp.float32)
    w2 = 0.2 * jax.random.normal(ks[4], (C, C, 3, 3), jnp.float32)
    g2 = 1.0 + 0.1 * jax.random.normal(ks[5], (C,), jnp.float32)
    b2 = 0.1 * jax.random.normal(ks[6], (C,), jnp.float32)

    params = (w1, g1, b1, w2, g2, b2)

    basic_block_jit = jax.jit(basic_block)
    y = basic_block_jit(x, params)
    jax.block_until_ready(y)

    y_ref = _ref_basic_block(x, *params)
    assert y.shape == (N, C, H, W)
    err = float(jnp.max(jnp.abs(y - y_ref)))
    assert jnp.allclose(y, y_ref, atol=2e-4, rtol=2e-4), err

    print("KERNEL_OK")
</pallas_src>

<mosaic_0001>
module attributes {stable_mosaic.version = 11 : i64} {
  func.func @_bn_relu_kernel(%arg0: i32, %arg1: memref<256x128xf32, #tpu.memory_space<vmem>>, %arg2: memref<8x128xf32, #tpu.memory_space<vmem>>, %arg3: memref<8x128xf32, #tpu.memory_space<vmem>>, %arg4: memref<256x128xf32, #tpu.memory_space<vmem>>) attributes {dimension_semantics = [#tpu.dimension_semantics<parallel>], iteration_bounds = array<i64: 2>, scalar_prefetch = 0 : i64, scratch_operands = 0 : i64, tpu.core_type = #tpu.core_type<tc>, window_params = [{transform_indices = @transform_0, window_bounds = array<i64: 256, 128>}, {pipeline_mode = #tpu.pipeline_mode<synchronous>, transform_indices = @transform_1, window_bounds = array<i64: 8, 128>}, {pipeline_mode = #tpu.pipeline_mode<synchronous>, transform_indices = @transform_2, window_bounds = array<i64: 8, 128>}, {transform_indices = @transform_3, window_bounds = array<i64: 256, 128>}]} {
    %c0 = arith.constant 0 : index
    %c0_0 = arith.constant 0 : index
    %0 = vector.load %arg2[%c0, %c0_0] : memref<8x128xf32, #tpu.memory_space<vmem>>, vector<1x128xf32>
    %cst = arith.constant 0.001953125 : f32
    %1 = vector.broadcast %cst : f32 to vector<1x128xf32>
    %2 = arith.mulf %0, %1 : vector<1x128xf32>
    %c1 = arith.constant 1 : index
    %c0_1 = arith.constant 0 : index
    %3 = vector.load %arg2[%c1, %c0_1] : memref<8x128xf32, #tpu.memory_space<vmem>>, vector<1x128xf32>
    %cst_2 = arith.constant 0.001953125 : f32
    %4 = vector.broadcast %cst_2 : f32 to vector<1x128xf32>
    %5 = arith.mulf %3, %4 : vector<1x128xf32>
    %6 = arith.mulf %2, %2 : vector<1x128xf32>
    %7 = arith.subf %5, %6 : vector<1x128xf32>
    %cst_3 = arith.constant 0.000000e+00 : f32
    %8 = vector.broadcast %cst_3 : f32 to vector<1x128xf32>
    %9 = arith.maximumf %7, %8 : vector<1x128xf32>
    %c0_4 = arith.constant 0 : index
    %c0_5 = arith.constant 0 : index
    %10 = vector.load %arg3[%c0_4, %c0_5] : memref<8x128xf32, #tpu.memory_space<vmem>>, vector<1x128xf32>
    %cst_6 = arith.constant 9.99999974E-6 : f32
    %11 = vector.broadcast %cst_6 : f32 to vector<1x128xf32>
    %12 = arith.addf %9, %11 : vector<1x128xf32>
    %13 = math.rsqrt %12 : vector<1x128xf32>
    %14 = arith.mulf %10, %13 : vector<1x128xf32>
    %c1_7 = arith.constant 1 : index
    %c0_8 = arith.constant 0 : index
    %15 = vector.load %arg3[%c1_7, %c0_8] : memref<8x128xf32, #tpu.memory_space<vmem>>, vector<1x128xf32>
    %16 = arith.mulf %2, %14 : vector<1x128xf32>
    %17 = arith.subf %15, %16 : vector<1x128xf32>
    %c0_9 = arith.constant 0 : index
    %c0_10 = arith.constant 0 : index
    %18 = vector.load %arg1[%c0_9, %c0_10] : memref<256x128xf32, #tpu.memory_space<vmem>>, vector<256x128xf32>
    %19 = vector.broadcast %14 : vector<1x128xf32> to vector<256x128xf32>
    %20 = arith.mulf %18, %19 : vector<256x128xf32>
    %21 = vector.broadcast %17 : vector<1x128xf32> to vector<256x128xf32>
    %22 = arith.addf %20, %21 : vector<256x128xf32>
    %cst_11 = arith.constant 0.000000e+00 : f32
    %23 = vector.broadcast %cst_11 : f32 to vector<256x128xf32>
    %24 = arith.maximumf %22, %23 : vector<256x128xf32>
    %c0_12 = arith.constant 0 : index
    %c0_13 = arith.constant 0 : index
    %25 = vector.load %arg4[%c0_12, %c0_13] : memref<256x128xf32, #tpu.memory_space<vmem>>, vector<256x128xf32>
    tpu.vector_store %arg4[%c0_12, %c0_13], %24 {strides = array<i32>} : memref<256x128xf32, #tpu.memory_space<vmem>>, vector<256x128xf32>,
    return
  }
  func.func @transform_0(%arg0: i32) -> (i32, i32) {
    %c0_i32 = arith.constant 0 : i32
    %c0_i32_0 = arith.constant 0 : i32
    return %arg0, %c0_i32 : i32, i32
  }
  func.func @transform_1(%arg0: i32) -> (i32, i32) {
    %c0_i32 = arith.constant 0 : i32
    %c0_i32_0 = arith.constant 0 : i32
    %c0_i32_1 = arith.constant 0 : i32
    return %c0_i32, %c0_i32_0 : i32, i32
  }
  func.func @transform_2(%arg0: i32) -> (i32, i32) {
    %c0_i32 = arith.constant 0 : i32
    %c0_i32_0 = arith.constant 0 : i32
    %c0_i32_1 = arith.constant 0 : i32
    return %c0_i32, %c0_i32_0 : i32, i32
  }
  func.func @transform_3(%arg0: i32) -> (i32, i32) {
    %c0_i32 = arith.constant 0 : i32
    %c0_i32_0 = arith.constant 0 : i32
    return %arg0, %c0_i32 : i32, i32
  }
}

module attributes {stable_mosaic.version = 11 : i64} {
  func.func @_conv_mm_kernel(%arg0: i32, %arg1: memref<256x128xf32, #tpu.memory_space<vmem>>, %arg2: memref<128x128xf32, #tpu.memory_space<vmem>>, %arg3: memref<256x128xf32, #tpu.memory_space<vmem>>, %arg4: memref<8x128xf32, #tpu.memory_space<vmem>>) attributes {dimension_semantics = [#tpu.dimension_semantics<arbitrary>], iteration_bounds = array<i64: 2>, scalar_prefetch = 0 : i64, scratch_operands = 0 : i64, tpu.core_type = #tpu.core_type<tc>, window_params = [{transform_indices = @transform_0, window_bounds = array<i64: 256, 128>}, {pipeline_mode = #tpu.pipeline_mode<synchronous>, transform_indices = @transform_1, window_bounds = array<i64: 128, 128>}, {transform_indices = @transform_2, window_bounds = array<i64: 256, 128>}, {pipeline_mode = #tpu.pipeline_mode<synchronous>, transform_indices = @transform_3, window_bounds = array<i64: 8, 128>}]} {
    %c0 = arith.constant 0 : index
    %c0_0 = arith.constant 0 : index
    %0 = vector.load %arg1[%c0, %c0_0] : memref<256x128xf32, #tpu.memory_space<vmem>>, vector<256x128xf32>
    %c0_1 = arith.constant 0 : index
    %c0_2 = arith.constant 0 : index
    %1 = vector.load %arg2[%c0_1, %c0_2] : memref<128x128xf32, #tpu.memory_space<vmem>>, vector<128x128xf32>
    %cst = arith.constant dense<0.000000e+00> : vector<256x128xf32>
    %2 = tpu.matmul %0, %1, %cst {dimension_numbers = #tpu.dot_dimension_numbers<[1], [0], [0], [1], [0, 0, 1, 1], [], []>} : vector<256x128xf32>, vector<128x128xf32>, vector<256x128xf32> -> vector<256x128xf32>
    %c0_3 = arith.constant 0 : index
    %c0_4 = arith.constant 0 : index
    %3 = vector.load %arg3[%c0_3, %c0_4] : memref<256x128xf32, #tpu.memory_space<vmem>>, vector<256x128xf32>
    tpu.vector_store %arg3[%c0_3, %c0_4], %2 {strides = array<i32>} : memref<256x128xf32, #tpu.memory_space<vmem>>, vector<256x128xf32>,
    %cst_5 = arith.constant dense<0.000000e+00> : vector<128xf32>
    %4 = vector.multi_reduction <add>, %2, %cst_5 [0] : vector<256x128xf32> to vector<128xf32>
    %5 = vector.shape_cast %4 : vector<128xf32> to vector<1x128xf32>
    %6 = arith.mulf %2, %2 : vector<256x128xf32>
    %cst_6 = arith.constant dense<0.000000e+00> : vector<128xf32>
    %7 = vector.multi_reduction <add>, %6, %cst_6 [0] : vector<256x128xf32> to vector<128xf32>
    %8 = vector.shape_cast %7 : vector<128xf32> to vector<1x128xf32>
    %9 = tpu.iota {dimensions = array<i32: 0>} : vector<8x128xi32>
    %c0_i32 = arith.constant 0 : i32
    %10 = vector.broadcast %c0_i32 : i32 to vector<8x128xi32>
    %11 = arith.cmpi eq, %9, %10 : vector<8x128xi32>
    %12 = vector.shape_cast %5 : vector<1x128xf32> to vector<1x128xf32>
    %13 = vector.broadcast %12 : vector<1x128xf32> to vector<8x128xf32>
    %c1_i32 = arith.constant 1 : i32
    %14 = vector.broadcast %c1_i32 : i32 to vector<8x128xi32>
    %15 = arith.cmpi eq, %9, %14 : vector<8x128xi32>
    %16 = vector.shape_cast %8 : vector<1x128xf32> to vector<1x128xf32>
    %17 = vector.broadcast %16 : vector<1x128xf32> to vector<8x128xf32>
    %cst_7 = arith.constant 0.000000e+00 : f32
    %18 = vector.broadcast %cst_7 : f32 to vector<8x128xf32>
    %19 = arith.select %15, %17, %18 : vector<8x128xi1>, vector<8x128xf32>
    %20 = arith.select %11, %13, %19 : vector<8x128xi1>, vector<8x128xf32>
    %c0_i32_8 = arith.constant 0 : i32
    %21 = arith.cmpi eq, %arg0, %c0_i32_8 : i32
    %22 = arith.extui %21 : i1 to i32
    %c0_i32_9 = arith.constant 0 : i32
    %23 = arith.cmpi ne, %22, %c0_i32_9 : i32
    scf.if %23 {
      %cst_14 = arith.constant 0.000000e+00 : f32
      %27 = vector.broadcast %cst_14 : f32 to vector<8x128xf32>
      %c0_15 = arith.constant 0 : index
      %c0_16 = arith.constant 0 : index
      %28 = vector.load %arg4[%c0_15, %c0_16] : memref<8x128xf32, #tpu.memory_space<vmem>>, vector<8x128xf32>
      tpu.vector_store %arg4[%c0_15, %c0_16], %27 {strides = array<i32>} : memref<8x128xf32, #tpu.memory_space<vmem>>, vector<8x128xf32>,
    } else {
    }
    %c0_10 = arith.constant 0 : index
    %c0_11 = arith.constant 0 : index
    %24 = vector.load %arg4[%c0_10, %c0_11] : memref<8x128xf32, #tpu.memory_space<vmem>>, vector<8x128xf32>
    %25 = arith.addf %24, %20 : vector<8x128xf32>
    %c0_12 = arith.constant 0 : index
    %c0_13 = arith.constant 0 : index
    %26 = vector.load %arg4[%c0_12, %c0_13] : memref<8x128xf32, #tpu.memory_space<vmem>>, vector<8x128xf32>
    tpu.vector_store %arg4[%c0_12, %c0_13], %25 {strides = array<i32>} : memref<8x128xf32, #tpu.memory_space<vmem>>, vector<8x128xf32>,
    return
  }
  func.func @transform_0(%arg0: i32) -> (i32, i32) {
    %c0_i32 = arith.constant 0 : i32
    %c0_i32_0 = arith.constant 0 : i32
    return %arg0, %c0_i32 : i32, i32
  }
  func.func @transform_1(%arg0: i32) -> (i32, i32) {
    %c0_i32 = arith.constant 0 : i32
    %c0_i32_0 = arith.constant 0 : i32
    %c0_i32_1 = arith.constant 0 : i32
    return %c0_i32, %c0_i32_0 : i32, i32
  }
  func.func @transform_2(%arg0: i32) -> (i32, i32) {
    %c0_i32 = arith.constant 0 : i32
    %c0_i32_0 = arith.constant 0 : i32
    return %arg0, %c0_i32 : i32, i32
  }
  func.func @transform_3(%arg0: i32) -> (i32, i32) {
    %c0_i32 = arith.constant 0 : i32
    %c0_i32_0 = arith.constant 0 : i32
    %c0_i32_1 = arith.constant 0 : i32
    return %c0_i32, %c0_i32_0 : i32, i32
  }
}

module attributes {stable_mosaic.version = 11 : i64} {
  func.func @_bn_add_relu_kernel(%arg0: i32, %arg1: memref<256x128xf32, #tpu.memory_space<vmem>>, %arg2: memref<256x128xf32, #tpu.memory_space<vmem>>, %arg3: memref<8x128xf32, #tpu.memory_space<vmem>>, %arg4: memref<8x128xf32, #tpu.memory_space<vmem>>, %arg5: memref<256x128xf32, #tpu.memory_space<vmem>>) attributes {dimension_semantics = [#tpu.dimension_semantics<parallel>], iteration_bounds = array<i64: 2>, scalar_prefetch = 0 : i64, scratch_operands = 0 : i64, tpu.core_type = #tpu.core_type<tc>, window_params = [{transform_indices = @transform_0, window_bounds = array<i64: 256, 128>}, {transform_indices = @transform_1, window_bounds = array<i64: 256, 128>}, {pipeline_mode = #tpu.pipeline_mode<synchronous>, transform_indices = @transform_2, window_bounds = array<i64: 8, 128>}, {pipeline_mode = #tpu.pipeline_mode<synchronous>, transform_indices = @transform_3, window_bounds = array<i64: 8, 128>}, {transform_indices = @transform_4, window_bounds = array<i64: 256, 128>}]} {
    %c0 = arith.constant 0 : index
    %c0_0 = arith.constant 0 : index
    %0 = vector.load %arg3[%c0, %c0_0] : memref<8x128xf32, #tpu.memory_space<vmem>>, vector<1x128xf32>
    %cst = arith.constant 0.001953125 : f32
    %1 = vector.broadcast %cst : f32 to vector<1x128xf32>
    %2 = arith.mulf %0, %1 : vector<1x128xf32>
    %c1 = arith.constant 1 : index
    %c0_1 = arith.constant 0 : index
    %3 = vector.load %arg3[%c1, %c0_1] : memref<8x128xf32, #tpu.memory_space<vmem>>, vector<1x128xf32>
    %cst_2 = arith.constant 0.001953125 : f32
    %4 = vector.broadcast %cst_2 : f32 to vector<1x128xf32>
    %5 = arith.mulf %3, %4 : vector<1x128xf32>
    %6 = arith.mulf %2, %2 : vector<1x128xf32>
    %7 = arith.subf %5, %6 : vector<1x128xf32>
    %cst_3 = arith.constant 0.000000e+00 : f32
    %8 = vector.broadcast %cst_3 : f32 to vector<1x128xf32>
    %9 = arith.maximumf %7, %8 : vector<1x128xf32>
    %c0_4 = arith.constant 0 : index
    %c0_5 = arith.constant 0 : index
    %10 = vector.load %arg4[%c0_4, %c0_5] : memref<8x128xf32, #tpu.memory_space<vmem>>, vector<1x128xf32>
    %cst_6 = arith.constant 9.99999974E-6 : f32
    %11 = vector.broadcast %cst_6 : f32 to vector<1x128xf32>
    %12 = arith.addf %9, %11 : vector<1x128xf32>
    %13 = math.rsqrt %12 : vector<1x128xf32>
    %14 = arith.mulf %10, %13 : vector<1x128xf32>
    %c1_7 = arith.constant 1 : index
    %c0_8 = arith.constant 0 : index
    %15 = vector.load %arg4[%c1_7, %c0_8] : memref<8x128xf32, #tpu.memory_space<vmem>>, vector<1x128xf32>
    %16 = arith.mulf %2, %14 : vector<1x128xf32>
    %17 = arith.subf %15, %16 : vector<1x128xf32>
    %c0_9 = arith.constant 0 : index
    %c0_10 = arith.constant 0 : index
    %18 = vector.load %arg1[%c0_9, %c0_10] : memref<256x128xf32, #tpu.memory_space<vmem>>, vector<256x128xf32>
    %19 = vector.broadcast %14 : vector<1x128xf32> to vector<256x128xf32>
    %20 = arith.mulf %18, %19 : vector<256x128xf32>
    %21 = vector.broadcast %17 : vector<1x128xf32> to vector<256x128xf32>
    %22 = arith.addf %20, %21 : vector<256x128xf32>
    %c0_11 = arith.constant 0 : index
    %c0_12 = arith.constant 0 : index
    %23 = vector.load %arg2[%c0_11, %c0_12] : memref<256x128xf32, #tpu.memory_space<vmem>>, vector<256x128xf32>
    %24 = arith.addf %22, %23 : vector<256x128xf32>
    %cst_13 = arith.constant 0.000000e+00 : f32
    %25 = vector.broadcast %cst_13 : f32 to vector<256x128xf32>
    %26 = arith.maximumf %24, %25 : vector<256x128xf32>
    %c0_14 = arith.constant 0 : index
    %c0_15 = arith.constant 0 : index
    %27 = vector.load %arg5[%c0_14, %c0_15] : memref<256x128xf32, #tpu.memory_space<vmem>>, vector<256x128xf32>
    tpu.vector_store %arg5[%c0_14, %c0_15], %26 {strides = array<i32>} : memref<256x128xf32, #tpu.memory_space<vmem>>, vector<256x128xf32>,
    return
  }
  func.func @transform_0(%arg0: i32) -> (i32, i32) {
    %c0_i32 = arith.constant 0 : i32
    %c0_i32_0 = arith.constant 0 : i32
    return %arg0, %c0_i32 : i32, i32
  }
  func.func @transform_1(%arg0: i32) -> (i32, i32) {
    %c0_i32 = arith.constant 0 : i32
    %c0_i32_0 = arith.constant 0 : i32
    return %arg0, %c0_i32 : i32, i32
  }
  func.func @transform_2(%arg0: i32) -> (i32, i32) {
    %c0_i32 = arith.constant 0 : i32
    %c0_i32_0 = arith.constant 0 : i32
    %c0_i32_1 = arith.constant 0 : i32
    return %c0_i32, %c0_i32_0 : i32, i32
  }
  func.func @transform_3(%arg0: i32) -> (i32, i32) {
    %c0_i32 = arith.constant 0 : i32
    %c0_i32_0 = arith.constant 0 : i32
    %c0_i32_1 = arith.constant 0 : i32
    return %c0_i32, %c0_i32_0 : i32, i32
  }
  func.func @transform_4(%arg0: i32) -> (i32, i32) {
    %c0_i32 = arith.constant 0 : i32
    %c0_i32_0 = arith.constant 0 : i32
    return %arg0, %c0_i32 : i32, i32
  }
}

</mosaic_0001>

<bundles_post_ra>
// kernel: basic_block.4
= control target key start
LH: loop header
LB: loop body
LE: loop exit
PB: predicated region body
PF: predicated region fallthrough
CT: control target
= control target key end

     0   :  { %s645_s12 = smov 0   ;;  %s906_s0 = inlined_call_operand.vmem [shape: f32[512,128], index: 0, kind: input, shape index: {}]   ;;  %s907_s1 = inlined_call_operand.vmem [shape: f32[128,128], index: 1, kind: input, shape index: {}]   ;;  %s908_s2 = inlined_call_operand.vmem [shape: f32[512,128], index: 2, kind: output, shape index: {0}]   ;;  %s909_s3 = inlined_call_operand.vmem [shape: f32[8,128], index: 3, kind: output, shape index: {1}]  }
   0x1 LB: > { %s547_s13 = sadd.s32 4294967295, %s622_s12   ;;  %p551_p0 = scmp.ge.s32.totalorder %s622_s12, 1  ;;  %s622_s12 = sphi %s645_s12, %s14_s12  }
   0x2   : > { %p136_p1 = scmp.lt.s32.totalorder %s622_s12, 3 }
   0x4   : > { %p137_p2 = pnand %p551_p0, %p136_p1 }
   0x5   : > { %s552_s30 = sshll.u32 (!%p137_p2), %s547_s13, 5  ;;  %p556_p4 = scmp.ne.s32.totalorder (!%p137_p2), %s547_s13, 0 }
   0x6   : > { %140 = sbr.rel (%p137_p2) target bundleno = 303 (0x12f), region = 28  ;;  %p161_p3 = scmp.lt.s32.totalorder (!%p137_p2), %s552_s30, 63 }
   0xb   : > { %v219_v0 = vld [vmem:[%s907_s1 + $0x78] sm:$0xff]  ;;  %v218_v1 = vld [vmem:[%s907_s1 + $0x70] sm:$0xff]  ;;  %v217_v2 = vld [vmem:[%s907_s1 + $0x68] sm:$0xff]  ;;  %s911_s30 = smov (!%p161_p3, %s552_s30), 63 }
   0xc   : > { %220 = vmatpush.msra.mxu0 %v219_v0  ;;  %559 = vmatpush.msra.mxu1 %v219_v0  ;;  %v216_v3 = vld [vmem:[%s907_s1 + $0x60] sm:$0xff]  ;;  %v215_v4 = vld [vmem:[%s907_s1 + $0x58] sm:$0xff]  ;;  %v214_v5 = vld [vmem:[%s907_s1 + $0x50] sm:$0xff]  ;;  %s553_s16 = sshll.u32 %s911_s30, 3 }
   0xd   : > { %560 = vmatpush.msra.mxu2 %v219_v0  ;;  %561 = vmatpush.msra.mxu3 %v219_v0  ;;  %v213_v6 = vld [vmem:[%s907_s1 + $0x48] sm:$0xff]  ;;  %v212_v7 = vld [vmem:[%s907_s1 + $0x40] sm:$0xff]  ;;  %v211_v8 = vld [vmem:[%s907_s1 + $0x38] sm:$0xff]  ;;  %s708_s23 = scalar_lea.vmem %s906_s0, %s553_s16  ;;  %s750_s28 = scalar_lea.vmem %s908_s2, %s553_s16 }
   0xe   : > { %221 = vmatpush.msra.mxu0 %v218_v1  ;;  %562 = vmatpush.msra.mxu1 %v218_v1  ;;  %v210_v9 = vld [vmem:[%s907_s1 + $0x30] sm:$0xff]  ;;  %v209_v10 = vld [vmem:[%s907_s1 + $0x28] sm:$0xff]  ;;  %v208_v11 = vld [vmem:[%s907_s1 + $0x20] sm:$0xff] }
   0xf   : > { %563 = vmatpush.msra.mxu2 %v218_v1  ;;  %564 = vmatpush.msra.mxu3 %v218_v1  ;;  %v207_v12 = vld [vmem:[%s907_s1 + $0x18] sm:$0xff]  ;;  %v206_v13 = vld [vmem:[%s907_s1 + $0x10] sm:$0xff]  ;;  %v205_v14 = vld [vmem:[%s907_s1 + $0x8] sm:$0xff] }
  0x10   : > { %222 = vmatpush.msra.mxu0 %v217_v2  ;;  %565 = vmatpush.msra.mxu1 %v217_v2  ;;  %v204_v15 = vld [vmem:[%s907_s1] sm:$0xff]  ;;  %v173_v19 = vld [vmem:[%s708_s23 + $0x8] sm:$0xff]  ;;  %v174_v23 = vld [vmem:[%s708_s23 + $0x10] sm:$0xff] }
  0x11   : > { %566 = vmatpush.msra.mxu2 %v217_v2  ;;  %567 = vmatpush.msra.mxu3 %v217_v2  ;;  %v172_v16 = vld [vmem:[%s708_s23] sm:$0xff]  ;;  %v181_v20 = vld [vmem:[%s708_s23 + $0x48] sm:$0xff]  ;;  %v182_v24 = vld [vmem:[%s708_s23 + $0x50] sm:$0xff] }
  0x12   : > { %223 = vmatpush.msra.mxu0 %v216_v3  ;;  %568 = vmatpush.msra.mxu1 %v216_v3  ;;  %v180_v17 = vld [vmem:[%s708_s23 + $0x40] sm:$0xff]  ;;  %v189_v21 = vld [vmem:[%s708_s23 + $0x88] sm:$0xff]  ;;  %v190_v25 = vld [vmem:[%s708_s23 + $0x90] sm:$0xff] }
  0x13   : > { %569 = vmatpush.msra.mxu2 %v216_v3  ;;  %570 = vmatpush.msra.mxu3 %v216_v3  ;;  %v188_v18 = vld [vmem:[%s708_s23 + $0x80] sm:$0xff]  ;;  %v197_v26 = vld [vmem:[%s708_s23 + $0xc8] sm:$0xff]  ;;  %v175_v27 = vld [vmem:[%s708_s23 + $0x18] sm:$0xff] }
  0x14   : > { %224 = vmatpush.msra.mxu0 %v215_v4  ;;  %571 = vmatpush.msra.mxu1 %v215_v4  ;;  %v196_v22 = vld [vmem:[%s708_s23 + $0xc0] sm:$0xff]  ;;  %v183_v28 = vld [vmem:[%s708_s23 + $0x58] sm:$0xff]  ;;  %v198_v30 = vld [vmem:[%s708_s23 + $0xd0] sm:$0xff] }
  0x15   : > { %572 = vmatpush.msra.mxu2 %v215_v4  ;;  %573 = vmatpush.msra.mxu3 %v215_v4  ;;  %v191_v29 = vld [vmem:[%s708_s23 + $0x98] sm:$0xff]  ;;  %v176_v31 = vld [vmem:[%s708_s23 + $0x20] sm:$0xff]  ;;  %v177_v35 = vld [vmem:[%s708_s23 + $0x28] sm:$0xff] }
  0x16   : > { %225 = vmatpush.msra.mxu0 %v214_v5  ;;  %574 = vmatpush.msra.mxu1 %v214_v5  ;;  %v184_v32 = vld [vmem:[%s708_s23 + $0x60] sm:$0xff]  ;;  %v199_v33 = vld [vmem:[%s708_s23 + $0xd8] sm:$0xff]  ;;  %v185_v36 = vld [vmem:[%s708_s23 + $0x68] sm:$0xff] }
  0x17   : > { %575 = vmatpush.msra.mxu2 %v214_v5  ;;  %576 = vmatpush.msra.mxu3 %v214_v5  ;;  %v192_v34 = vld [vmem:[%s708_s23 + $0xa0] sm:$0xff]  ;;  %v193_v38 = vld [vmem:[%s708_s23 + $0xa8] sm:$0xff]  ;;  %v178_v39 = vld [vmem:[%s708_s23 + $0x30] sm:$0xff] }
  0x18   : > { %226 = vmatpush.msra.mxu0 %v213_v6  ;;  %577 = vmatpush.msra.mxu1 %v213_v6  ;;  %v200_v37 = vld [vmem:[%s708_s23 + $0xe0] sm:$0xff]  ;;  %v186_v40 = vld [vmem:[%s708_s23 + $0x70] sm:$0xff]  ;;  %v201_v41 = vld [vmem:[%s708_s23 + $0xe8] sm:$0xff] }
  0x19   : > { %578 = vmatpush.msra.mxu2 %v213_v6  ;;  %579 = vmatpush.msra.mxu3 %v213_v6  ;;  %v194_v42 = vld [vmem:[%s708_s23 + $0xb0] sm:$0xff]  ;;  %v179_v43 = vld [vmem:[%s708_s23 + $0x38] sm:$0xff] }
  0x1a   : > { %227 = vmatpush.msra.mxu0 %v212_v7  ;;  %580 = vmatpush.msra.mxu1 %v212_v7  ;;  %v187_v44 = vld [vmem:[%s708_s23 + $0x78] sm:$0xff]  ;;  %v202_v45 = vld [vmem:[%s708_s23 + $0xf0] sm:$0xff] }
  0x1b   : > { %581 = vmatpush.msra.mxu2 %v212_v7  ;;  %582 = vmatpush.msra.mxu3 %v212_v7  ;;  %v195_v46 = vld [vmem:[%s708_s23 + $0xb8] sm:$0xff] }
  0x1c   : > { %228 = vmatpush.msra.mxu0 %v211_v8  ;;  %583 = vmatpush.msra.mxu1 %v211_v8  ;;  %v203_v47 = vld [vmem:[%s708_s23 + $0xf8] sm:$0xff] }
  0x1d   : > { %584 = vmatpush.msra.mxu2 %v211_v8  ;;  %585 = vmatpush.msra.mxu3 %v211_v8 }
  0x1e   : > { %229 = vmatpush.msra.mxu0 %v210_v9  ;;  %586 = vmatpush.msra.mxu1 %v210_v9 }
  0x1f   : > { %587 = vmatpush.msra.mxu2 %v210_v9  ;;  %588 = vmatpush.msra.mxu3 %v210_v9 }
  0x20   : > { %230 = vmatpush.msra.mxu0 %v209_v10  ;;  %589 = vmatpush.msra.mxu1 %v209_v10 }
  0x21   : > { %590 = vmatpush.msra.mxu2 %v209_v10  ;;  %591 = vmatpush.msra.mxu3 %v209_v10 }
  0x22   : > { %231 = vmatpush.msra.mxu0 %v208_v11  ;;  %592 = vmatpush.msra.mxu1 %v208_v11 }
  0x23   : > { %593 = vmatpush.msra.mxu2 %v208_v11  ;;  %594 = vmatpush.msra.mxu3 %v208_v11 }
  0x24   : > { %232 = vmatpush.msra.mxu0 %v207_v12  ;;  %595 = vmatpush.msra.mxu1 %v207_v12 }
  0x25   : > { %596 = vmatpush.msra.mxu2 %v207_v12  ;;  %597 = vmatpush.msra.mxu3 %v207_v12 }
  0x26   : > { %233 = vmatpush.msra.mxu0 %v206_v13  ;;  %598 = vmatpush.msra.mxu1 %v206_v13 }
  0x27   : > { %599 = vmatpush.msra.mxu2 %v206_v13  ;;  %600 = vmatpush.msra.mxu3 %v206_v13 }
  0x28   : > { %234 = vmatpush.msra.mxu0 %v205_v14  ;;  %601 = vmatpush.msra.mxu1 %v205_v14 }
  0x29   : > { %602 = vmatpush.msra.mxu2 %v205_v14  ;;  %603 = vmatpush.msra.mxu3 %v205_v14 }
  0x2a   : > { %235 = vmatpush.msra.mxu0 %v204_v15  ;;  %604 = vmatpush.msra.mxu1 %v204_v15 }
  0x2b   : > { %236 = vmatmul.f32.vlgmr.msra.gmra.mxu0 %v172_v16  ;;  %260 = vmatmul.f32.vlgmr.msra.gmra.mxu1 %v180_v17 }
  0x2c   : > { %605 = vmatpush.msra.mxu2 %v204_v15  ;;  %606 = vmatpush.msra.mxu3 %v204_v15 }
  0x2d   : > { %284 = vmatmul.f32.vlgmr.msra.gmra.mxu2 %v188_v18  ;;  %308 = vmatmul.f32.vlgmr.msra.gmra.mxu3 %v196_v22 }
  0x33   : > { %239 = vmatmul.f32.gmra.mxu0 %v173_v19  ;;  %263 = vmatmul.f32.gmra.mxu1 %v181_v20 }
  0x35   : > { %287 = vmatmul.f32.gmra.mxu2 %v189_v21  ;;  %311 = vmatmul.f32.gmra.mxu3 %v197_v26 }
  0x3b   : > { %242 = vmatmul.f32.gmra.mxu0 %v174_v23  ;;  %266 = vmatmul.f32.gmra.mxu1 %v182_v24 }
  0x3d   : > { %290 = vmatmul.f32.gmra.mxu2 %v190_v25  ;;  %314 = vmatmul.f32.gmra.mxu3 %v198_v30 }
  0x43   : > { %245 = vmatmul.f32.gmra.mxu0 %v175_v27  ;;  %269 = vmatmul.f32.gmra.mxu1 %v183_v28 }
  0x45   : > { %293 = vmatmul.f32.gmra.mxu2 %v191_v29  ;;  %317 = vmatmul.f32.gmra.mxu3 %v199_v33 }
  0x4b   : > { %248 = vmatmul.f32.gmra.mxu0 %v176_v31  ;;  %272 = vmatmul.f32.gmra.mxu1 %v184_v32 }
  0x4d   : > { %296 = vmatmul.f32.gmra.mxu2 %v192_v34  ;;  %320 = vmatmul.f32.gmra.mxu3 %v200_v37 }
  0x53   : > { %251 = vmatmul.f32.gmra.mxu0 %v177_v35  ;;  %275 = vmatmul.f32.gmra.mxu1 %v185_v36 }
  0x55   : > { %299 = vmatmul.f32.gmra.mxu2 %v193_v38  ;;  %323 = vmatmul.f32.gmra.mxu3 %v201_v41 }
  0x5b   : > { %254 = vmatmul.f32.gmra.mxu0 %v178_v39  ;;  %278 = vmatmul.f32.gmra.mxu1 %v186_v40 }
  0x5d   : > { %302 = vmatmul.f32.gmra.mxu2 %v194_v42  ;;  %326 = vmatmul.f32.gmra.mxu3 %v202_v45 }
  0x63   : > { %257 = vmatmul.f32.gmra.mxu0 %v179_v43  ;;  %281 = vmatmul.f32.gmra.mxu1 %v187_v44 }
  0x65   : > { %305 = vmatmul.f32.gmra.mxu2 %v195_v46  ;;  %329 = vmatmul.f32.gmra.mxu3 %v203_v47 }
  0xa8   : > { %v237_v48 = vpop.f32.mrf.mxu0  ;;  %v752_v49 = vpop.f32.mrf.mxu1 }
  0xa9   : > { %333 = vst [vmem:[%s750_s28] sm:$0xff] %v237_v48  ;;  %v402_v6 = vmul.f32 %v237_v48, %v237_v48  ;;  %v410_v34 = vmul.f32 %v752_v49, %v752_v49 }
  0xaa   : > { %341 = vst [vmem:[%s750_s28 + $0x40] sm:$0xff] %v752_v49 }
  0xb0   : > { %v240_v50 = vpop.f32.mrf.mxu0  ;;  %v757_v51 = vpop.f32.mrf.mxu1 }
  0xb1   : > { %334 = vst [vmem:[%s750_s28 + $0x8] sm:$0xff] %v240_v50  ;;  %v760_v52 = vpop.f32.mrf.mxu2  ;;  %v771_v56 = vpop.f32.mrf.mxu3  ;;  %v403_v5 = vmul.f32 %v240_v50, %v240_v50  ;;  %v365_v7 = vadd.f32 %v240_v50, %v237_v48  ;;  %v411_v37 = vmul.f32 %v757_v51, %v757_v51 }
  0xb2   : > { %342 = vst [vmem:[%s750_s28 + $0x48] sm:$0xff] %v757_v51 }
  0xb3   : > { %349 = vst [vmem:[%s750_s28 + $0x80] sm:$0xff] %v760_v52  ;;  %v434_v9 = vadd.f32 %v403_v5, %v402_v6 }
  0xb4   : > { %357 = vst [vmem:[%s750_s28 + $0xc0] sm:$0xff] %v771_v56 }
  0xb8   : > { %v243_v53 = vpop.f32.mrf.mxu0  ;;  %v766_v54 = vpop.f32.mrf.mxu1 }
  0xb9   : > { %335 = vst [vmem:[%s750_s28 + $0x10] sm:$0xff] %v243_v53  ;;  %v769_v55 = vpop.f32.mrf.mxu2  ;;  %v784_v60 = vpop.f32.mrf.mxu3  ;;  %v404_v8 = vmul.f32 %v243_v53, %v243_v53  ;;  %v366_v10 = vadd.f32 %v365_v7, %v243_v53  ;;  %v412_v40 = vmul.f32 %v766_v54, %v766_v54 }
  0xba   : > { %343 = vst [vmem:[%s750_s28 + $0x50] sm:$0xff] %v766_v54 }
  0xbb   : > { %350 = vst [vmem:[%s750_s28 + $0x88] sm:$0xff] %v769_v55  ;;  %v435_v14 = vadd.f32 %v434_v9, %v404_v8  ;;  %v418_v8 = vmul.f32 %v760_v52, %v760_v52 }
  0xbc   : > { %358 = vst [vmem:[%s750_s28 + $0xc8] sm:$0xff] %v784_v60 }
  0xc0   : > { %v246_v57 = vpop.f32.mrf.mxu0  ;;  %v779_v58 = vpop.f32.mrf.mxu1 }
  0xc1   : > { %336 = vst [vmem:[%s750_s28 + $0x18] sm:$0xff] %v246_v57  ;;  %v782_v59 = vpop.f32.mrf.mxu2  ;;  %v797_v0 = vpop.f32.mrf.mxu3  ;;  %v405_v11 = vmul.f32 %v246_v57, %v246_v57  ;;  %v367_v15 = vadd.f32 %v366_v10, %v246_v57  ;;  %v413_v43 = vmul.f32 %v779_v58, %v779_v58  ;;  %v419_v10 = vmul.f32 %v769_v55, %v769_v55 }
  0xc2   : > { %344 = vst [vmem:[%s750_s28 + $0x58] sm:$0xff] %v779_v58 }
  0xc3   : > { %351 = vst [vmem:[%s750_s28 + $0x90] sm:$0xff] %v782_v59  ;;  %v436_v19 = vadd.f32 %v435_v14, %v405_v11 }
  0xc4   : > { %359 = vst [vmem:[%s750_s28 + $0xd0] sm:$0xff] %v797_v0 }
  0xc8   : > { %v249_v61 = vpop.f32.mrf.mxu0  ;;  %v792_v62 = vpop.f32.mrf.mxu1 }
  0xc9   : > { %337 = vst [vmem:[%s750_s28 + $0x20] sm:$0xff] %v249_v61  ;;  %v795_v63 = vpop.f32.mrf.mxu2  ;;  %v810_v4 = vpop.f32.mrf.mxu3  ;;  %v406_v16 = vmul.f32 %v249_v61, %v249_v61  ;;  %v368_v20 = vadd.f32 %v367_v15, %v249_v61  ;;  %v414_v48 = vmul.f32 %v792_v62, %v792_v62 }
  0xca   : > { %345 = vst [vmem:[%s750_s28 + $0x60] sm:$0xff] %v792_v62  ;;  %v421_v15 = vmul.f32 %v795_v63, %v795_v63 }
  0xcb   : > { %352 = vst [vmem:[%s750_s28 + $0x98] sm:$0xff] %v795_v63  ;;  %v437_v22 = vadd.f32 %v436_v19, %v406_v16 }
  0xcc   : > { %360 = vst [vmem:[%s750_s28 + $0xd8] sm:$0xff] %v810_v4 }
  0xd0   : > { %v252_v1 = vpop.f32.mrf.mxu0  ;;  %v805_v2 = vpop.f32.mrf.mxu1 }
  0xd1   : > { %338 = vst [vmem:[%s750_s28 + $0x28] sm:$0xff] %v252_v1  ;;  %v808_v3 = vpop.f32.mrf.mxu2  ;;  %v821_v18 = vpop.f32.mrf.mxu3  ;;  %v407_v21 = vmul.f32 %v252_v1, %v252_v1  ;;  %v369_v23 = vadd.f32 %v368_v20, %v252_v1  ;;  %v415_v53 = vmul.f32 %v805_v2, %v805_v2 }
  0xd2   : > { %346 = vst [vmem:[%s750_s28 + $0x68] sm:$0xff] %v805_v2 }
  0xd3   : > { %353 = vst [vmem:[%s750_s28 + $0xa0] sm:$0xff] %v808_v3  ;;  %v438_v25 = vadd.f32 %v437_v22, %v407_v21 }
  0xd4   : > { %361 = vst [vmem:[%s750_s28 + $0xe0] sm:$0xff] %v821_v18 }
  0xd8   : > { %v255_v12 = vpop.f32.mrf.mxu0  ;;  %v279_v13 = vpop.f32.mrf.mxu1 }
  0xd9   : > { %339 = vst [vmem:[%s750_s28 + $0x30] sm:$0xff] %v255_v12  ;;  %v819_v17 = vpop.f32.mrf.mxu2  ;;  %v408_v24 = vmul.f32 %v255_v12, %v255_v12  ;;  %v370_v26 = vadd.f32 %v369_v23, %v255_v12  ;;  %v829_v33 = vpop.f32.mrf.mxu3  ;;  %v420_v12 = vmul.f32 %v782_v59, %v782_v59 }
  0xda   : > { %347 = vst [vmem:[%s750_s28 + $0x70] sm:$0xff] %v279_v13  ;;  %v423_v22 = vmul.f32 %v819_v17, %v819_v17 }
  0xdb   : > { %354 = vst [vmem:[%s750_s28 + $0xa8] sm:$0xff] %v819_v17  ;;  %v439_v29 = vadd.f32 %v438_v25, %v408_v24 }
  0xdc   : > { %362 = vst [vmem:[%s750_s28 + $0xe8] sm:$0xff] %v829_v33 }
  0xe0   : > { %v258_v27 = vpop.f32.mrf.mxu0  ;;  %v282_v28 = vpop.f32.mrf.mxu1 }
  0xe1   : > { %340 = vst [vmem:[%s750_s28 + $0x38] sm:$0xff] %v258_v27  ;;  %v371_v30 = vadd.f32 %v370_v26, %v258_v27  ;;  %v409_v31 = vmul.f32 %v258_v27, %v258_v27  ;;  %v303_v32 = vpop.f32.mrf.mxu2  ;;  %v327_v47 = vpop.f32.mrf.mxu3  ;;  %v417_v1 = vmul.f32 %v282_v28, %v282_v28 }
  0xe2   : > { %348 = vst [vmem:[%s750_s28 + $0x78] sm:$0xff] %v282_v28  ;;  %v424_v25 = vmul.f32 %v303_v32, %v303_v32 }
  0xe3   : > { %v372_v35 = vadd.f32 %v371_v30, %v752_v49  ;;  %v440_v36 = vadd.f32 %v439_v29, %v409_v31  ;;  %355 = vst [vmem:[%s750_s28 + $0xb0] sm:$0xff] %v303_v32 }
  0xe4   : > { %363 = vst [vmem:[%s750_s28 + $0xf0] sm:$0xff] %v327_v47 }
  0xe5   : > { %v373_v38 = vadd.f32 %v372_v35, %v757_v51  ;;  %v441_v39 = vadd.f32 %v440_v36, %v410_v34  ;;  %v429_v36 = vmul.f32 %v810_v4, %v810_v4 }
  0xe7   : > { %v374_v41 = vadd.f32 %v373_v38, %v766_v54  ;;  %v442_v42 = vadd.f32 %v441_v39, %v411_v37 }
  0xe9   : > { %v443_v44 = vadd.f32 %v442_v42, %v412_v40  ;;  %v375_v45 = vadd.f32 %v374_v41, %v779_v58  ;;  %v306_v46 = vpop.f32.mrf.mxu2  ;;  %v416_v58 = vmul.f32 %v279_v13, %v279_v13  ;;  %v330_v7 = vpop.f32.mrf.mxu3  ;;  %v431_v41 = vmul.f32 %v829_v33, %v829_v33 }
  0xea   : > { %356 = vst [vmem:[%s750_s28 + $0xb8] sm:$0xff] %v306_v46  ;;  %v425_v26 = vmul.f32 %v306_v46, %v306_v46 }
  0xeb   : > { %v376_v49 = vadd.f32 %v375_v45, %v792_v62  ;;  %v444_v50 = vadd.f32 %v443_v44, %v413_v43  ;;  %364 = vst [vmem:[%s750_s28 + $0xf8] sm:$0xff] %v330_v7  ;;  %v432_v44 = vmul.f32 %v327_v47, %v327_v47  ;;  %v433_v45 = vmul.f32 %v330_v7, %v330_v7 }
  0xed   : > { %v377_v51 = vadd.f32 %v376_v49, %v805_v2  ;;  %v445_v54 = vadd.f32 %v444_v50, %v414_v48 }
  0xef   : > { %v446_v57 = vadd.f32 %v445_v54, %v415_v53  ;;  %v378_v61 = vadd.f32 %v377_v51, %v279_v13  ;;  %v471_v53 = vlaneseq }
  0xf1   : > { %v447_v5 = vadd.f32 %v446_v57, %v416_v58  ;;  %v379_v6 = vadd.f32 %v378_v61, %v282_v28  ;;  %v472_v58 = vshrl.u32 %v471_v53, 7 }
  0xf3   : > { %v380_v62 = vadd.f32 %v379_v6, %v760_v52  ;;  %v448_v9 = vadd.f32 %v447_v5, %v417_v1  ;;  %v422_v52 = vmul.f32 %v808_v3, %v808_v3  ;;  %vm474_vm0 = vcmp.eq.s32.totalorder %v472_v58, 1 }
  0xf4   : > { %vm473_vm1 = vcmp.eq.s32.totalorder %v472_v58, 0 }
  0xf5   : > { %v381_v2 = vadd.f32 %v380_v62, %v769_v55  ;;  %v449_v11 = vadd.f32 %v448_v9, %v418_v8 }
  0xf7   : > { %v382_v13 = vadd.f32 %v381_v2, %v782_v59  ;;  %v450_v14 = vadd.f32 %v449_v11, %v419_v10 }
  0xf9   : > { %v451_v16 = vadd.f32 %v450_v14, %v420_v12  ;;  %v383_v19 = vadd.f32 %v382_v13, %v795_v63  ;;  %v426_v63 = vmul.f32 %v771_v56, %v771_v56 }
  0xfb   : > { %v384_v20 = vadd.f32 %v383_v19, %v808_v3  ;;  %v452_v21 = vadd.f32 %v451_v16, %v421_v15  ;;  %v427_v3 = vmul.f32 %v784_v60, %v784_v60 }
  0xfd   : > { %v385_v55 = vadd.f32 %v384_v20, %v819_v17  ;;  %v453_v23 = vadd.f32 %v452_v21, %v422_v52  ;;  %v428_v17 = vmul.f32 %v797_v0, %v797_v0 }
  0xff   : > { %v454_v59 = vadd.f32 %v453_v23, %v423_v22  ;;  %v386_v24 = vadd.f32 %v385_v55, %v303_v32 }
 0x101   : > { %v455_v27 = vadd.f32 %v454_v59, %v424_v25  ;;  %v387_v28 = vadd.f32 %v386_v24, %v306_v46 }
 0x103   : > { %v388_v29 = vadd.f32 %v387_v28, %v771_v56  ;;  %v456_v30 = vadd.f32 %v455_v27, %v425_v26  ;;  %v430_v56 = vmul.f32 %v821_v18, %v821_v18 }
 0x105   : > { %v389_v31 = vadd.f32 %v388_v29, %v784_v60  ;;  %v457_v34 = vadd.f32 %v456_v30, %v426_v63 }
 0x107   : > { %v390_v32 = vadd.f32 %v389_v31, %v797_v0  ;;  %v458_v35 = vadd.f32 %v457_v34, %v427_v3 }
 0x109   : > { %v459_v37 = vadd.f32 %v458_v35, %v428_v17  ;;  %v391_v38 = vadd.f32 %v390_v32, %v810_v4 }
 0x10b   : > { %v392_v39 = vadd.f32 %v391_v38, %v821_v18  ;;  %v460_v40 = vadd.f32 %v459_v37, %v429_v36 }
 0x10d   : > { %v393_v60 = vadd.f32 %v392_v39, %v829_v33  ;;  %v461_v42 = vadd.f32 %v460_v40, %v430_v56 }
 0x10f   : > { %v462_v0 = vadd.f32 %v461_v42, %v431_v41  ;;  %v394_v43 = vadd.f32 %v393_v60, %v327_v47 }
 0x111   : > { %v463_v46 = vadd.f32 %v462_v0, %v432_v44  ;;  %v395_v48 = vadd.f32 %v394_v43, %v330_v7 }
 0x113   : > { %v396_v49 = vrot.slane %v395_v48, 4  ;;  %v464_v4 = vadd.f32 %v463_v46, %v433_v45 }
 0x115   : > { %v397_v50 = vadd.f32 %v396_v49, %v395_v48  ;;  %v465_v51 = vrot.slane %v464_v4, 4 }
 0x117   : > { %v398_v54 = vrot.slane %v397_v50, 2  ;;  %v466_v18 = vadd.f32 %v465_v51, %v464_v4 }
 0x119   : > { %v399_v57 = vadd.f32 %v398_v54, %v397_v50  ;;  %v467_v61 = vrot.slane %v466_v18, 2 }
 0x11b   : > { %v468_v1 = vadd.f32 %v467_v61, %v466_v18  ;;  %v400_v5 = vrot.slane %v399_v57, 1 }
 0x11d   : > { %v469_v33 = vrot.slane %v468_v1, 1  ;;  %v401_v47 = vadd.f32 %v400_v5, %v399_v57 }
 0x11e   : > { %480 = sbr.rel (%p556_p4) target bundleno = 293 (0x125), region = 32 }
 0x11f   : > { %v470_v6 = vadd.f32 %v469_v33, %v468_v1 }
 0x121   : > { %v475_v8 = vsel %vm474_vm0, %v470_v6, 0.0 }
 0x122   : > { %v476_v62 = vsel %vm473_vm1, %v401_v47, %v475_v8 }
 0x123   : > { %v624_v7 = vmov 0.0  }
 0x124   : > { %481 = vst [vmem:[%s909_s3] sm:$0xff] %v624_v7 }
 0x125 PF:  {}
 0x12b   : > { %v482_v9 = vld [vmem:[%s909_s3] sm:$0xff] }
 0x12c   : > { %v483_v10 = vadd.f32 %v482_v9, %v476_v62 }
 0x12e   : > { %484 = vst [vmem:[%s909_s3] sm:$0xff] %v483_v10 }
 0x12f PF: > { %s14_s12 = sadd.s32 1, %s622_s12  }
 0x130   : > { %p11_p5 = scmp.ge.s32.totalorder %s14_s12, 4  }
 0x132   :  { %13 = sbr.rel (!%p11_p5) target bundleno = 1 (0x1), region = 70 }

// kernel: basic_block.7
= control target key start
LH: loop header
LB: loop body
LE: loop exit
PB: predicated region body
PF: predicated region fallthrough
CT: control target
= control target key end

     0   :  { %s596_s15 = smov 0   ;;  %s809_s0 = inlined_call_operand.vmem [shape: f32[512,128], index: 0, kind: input, shape index: {}]   ;;  %s810_s1 = inlined_call_operand.vmem [shape: f32[512,128], index: 1, kind: input, shape index: {}]   ;;  %s811_s2 = inlined_call_operand.vmem [shape: f32[8,128], index: 2, kind: input, shape index: {}]   ;;  %s812_s3 = inlined_call_operand.vmem [shape: f32[8,128], index: 3, kind: input, shape index: {}]   ;;  %s813_s4 = inlined_call_operand.vmem [shape: f32[512,128], index: 4, kind: output, shape index: {}]  }
   0x1 LB: > { %s540_s16 = sadd.s32 4294967295, %s569_s15   ;;  %p544_p0 = scmp.ge.s32.totalorder %s569_s15, 1  ;;  %s569_s15 = sphi %s596_s15, %s14_s15  }
   0x2   : > { %p174_p1 = scmp.lt.s32.totalorder %s569_s15, 3 }
   0x4   : > { %p175_p2 = pnand %p544_p0, %p174_p1 }
   0x5   : > { %s545_s21 = sshll.u32 (!%p175_p2), %s540_s16, 5 }
   0x6   : > { %178 = sbr.rel (%p175_p2) target bundleno = 86 (0x56), region = 36  ;;  %p206_p3 = scmp.lt.s32.totalorder (!%p175_p2), %s545_s21, 63 }
   0xb   : > { %v223_v0 = vld [vmem:[%s811_s2] sm:$0x1]  ;;  %v225_v1 = vld [vmem:[%s811_s2 + $0x1] sm:$0x1]  ;;  %s815_s21 = smov (!%p206_p3, %s545_s21), 63 }
   0xc   : > { %v224_v2 = vmul.f32 0.001953125, %v223_v0  ;;  %v226_v3 = vmul.f32 0.001953125, %v225_v1  ;;  %s610_s22 = sshll.u32 %s815_s21, 3  ;;  %v230_v13 = vld [vmem:[%s812_s3] sm:$0x1] }
   0xd   : > { %s616_s25 = scalar_lea.vmem %s809_s0, %s610_s22  ;;  %v243_v17 = vld [vmem:[%s812_s3 + $0x1] sm:$0x1]  ;;  %s638_s6 = scalar_lea.vmem %s810_s1, %s610_s22 }
   0xe   : > { %v227_v4 = vmul.f32 %v224_v2, %v224_v2  ;;  %v246_v18 = vld [vmem:[%s616_s25] sm:$0xff]  ;;  %v247_v19 = vld [vmem:[%s616_s25 + $0x8] sm:$0xff]  ;;  %v248_v20 = vld [vmem:[%s616_s25 + $0x10] sm:$0xff]  ;;  %s682_s9 = scalar_lea.vmem %s813_s4, %s610_s22 }
   0xf   : > { %v249_v21 = vld [vmem:[%s616_s25 + $0x18] sm:$0xff]  ;;  %v250_v22 = vld [vmem:[%s616_s25 + $0x20] sm:$0xff]  ;;  %v251_v25 = vld [vmem:[%s616_s25 + $0x28] sm:$0xff] }
  0x10   : > { %v228_v5 = vsub.f32 %v226_v3, %v227_v4  ;;  %v252_v26 = vld [vmem:[%s616_s25 + $0x30] sm:$0xff]  ;;  %v253_v27 = vld [vmem:[%s616_s25 + $0x38] sm:$0xff]  ;;  %v254_v28 = vld [vmem:[%s616_s25 + $0x40] sm:$0xff] }
  0x11   : > { %v255_v29 = vld [vmem:[%s616_s25 + $0x48] sm:$0xff]  ;;  %v256_v30 = vld [vmem:[%s616_s25 + $0x50] sm:$0xff]  ;;  %v257_v35 = vld [vmem:[%s616_s25 + $0x58] sm:$0xff] }
  0x12   : > { %v229_v6 = vmax.f32 %v228_v5, 0.0  ;;  %v258_v36 = vld [vmem:[%s616_s25 + $0x60] sm:$0xff]  ;;  %v259_v37 = vld [vmem:[%s616_s25 + $0x68] sm:$0xff]  ;;  %v346_v48 = vld [vmem:[%s638_s6 + $0x10] sm:$0xff] }
  0x13   : > { %v344_v43 = vld [vmem:[%s638_s6] sm:$0xff]  ;;  %v345_v44 = vld [vmem:[%s638_s6 + $0x8] sm:$0xff]  ;;  %v347_v49 = vld [vmem:[%s638_s6 + $0x18] sm:$0xff] }
  0x14   : > { %v231_v7 = vadd.f32 1e-05, %v229_v6  ;;  %v348_v50 = vld [vmem:[%s638_s6 + $0x20] sm:$0xff]  ;;  %v349_v59 = vld [vmem:[%s638_s6 + $0x28] sm:$0xff]  ;;  %v350_v60 = vld [vmem:[%s638_s6 + $0x30] sm:$0xff] }
  0x15   : > { %v351_v61 = vld [vmem:[%s638_s6 + $0x38] sm:$0xff] }
  0x16   : > { %561 = vrsqrt.f32 %v231_v7  ;;  %vm238_vm0 = vweird.f32 %v231_v7 }
  0x1c   : > { %v562_v8 = vpop.eup %561 }
  0x1d   : > { %v233_v9 = vmul.f32 %v562_v8, %v231_v7  ;;  %vm239_vm1 = vweird.f32 %v562_v8 }
  0x1e   : > { %vm240_vm2 = vmor %vm238_vm0, %vm239_vm1 }
  0x1f   : > { %v234_v10 = vmul.f32 %v562_v8, %v233_v9 }
  0x21   : > { %v235_v11 = vmul.f32 0.5, %v234_v10  ;;  %v352_v10 = vld [vmem:[%s638_s6 + $0x40] sm:$0xff] }
  0x23   : > { %v236_v12 = vsub.f32 1.5, %v235_v11  ;;  %v353_v11 = vld [vmem:[%s638_s6 + $0x48] sm:$0xff] }
  0x25   : > { %v237_v14 = vmul.f32 %v562_v8, %v236_v12 }
  0x27   : > { %v241_v15 = vsel %vm240_vm2, %v562_v8, %v237_v14 }
  0x28   : > { %v242_v16 = vmul.f32 %v241_v15, %v230_v13 }
  0x2a   : > { %v244_v23 = vmul.f32 %v242_v16, %v224_v2  ;;  %v629_v24 = vperm.slane %v242_v16, 0  ;;  %v260_v16 = vld [vmem:[%s616_s25 + $0x70] sm:$0xff] }
  0x2c   : > { %v245_v31 = vsub.f32 %v243_v17, %v244_v23  ;;  %v279_v32 = vmul.f32 %v629_v24, %v246_v18  ;;  %v280_v33 = vmul.f32 %v629_v24, %v247_v19  ;;  %v281_v34 = vmul.f32 %v629_v24, %v248_v20  ;;  %v261_v17 = vld [vmem:[%s616_s25 + $0x78] sm:$0xff] }
  0x2d   : > { %v282_v38 = vmul.f32 %v629_v24, %v249_v21  ;;  %v283_v39 = vmul.f32 %v629_v24, %v250_v22  ;;  %v284_v40 = vmul.f32 %v629_v24, %v251_v25  ;;  %v285_v41 = vmul.f32 %v629_v24, %v252_v26  ;;  %v354_v22 = vld [vmem:[%s638_s6 + $0x50] sm:$0xff]  ;;  %v355_v23 = vld [vmem:[%s638_s6 + $0x58] sm:$0xff] }
  0x2e   : > { %v653_v42 = vperm.slane %v245_v31, 0  ;;  %v286_v45 = vmul.f32 %v629_v24, %v253_v27  ;;  %v287_v46 = vmul.f32 %v629_v24, %v254_v28  ;;  %v288_v47 = vmul.f32 %v629_v24, %v255_v29  ;;  %v356_v29 = vld [vmem:[%s638_s6 + $0x60] sm:$0xff] }
  0x2f   : > { %v289_v51 = vmul.f32 %v629_v24, %v256_v30  ;;  %v290_v52 = vmul.f32 %v629_v24, %v257_v35  ;;  %v291_v53 = vmul.f32 %v629_v24, %v258_v36  ;;  %v292_v54 = vmul.f32 %v629_v24, %v259_v37  ;;  %v357_v30 = vld [vmem:[%s638_s6 + $0x68] sm:$0xff]  ;;  %v262_v35 = vld [vmem:[%s616_s25 + $0x80] sm:$0xff] }
  0x30   : > { %v312_v55 = vadd.f32 %v653_v42, %v279_v32  ;;  %v313_v56 = vadd.f32 %v653_v42, %v280_v33  ;;  %v314_v57 = vadd.f32 %v653_v42, %v281_v34  ;;  %v315_v58 = vadd.f32 %v653_v42, %v282_v38 }
  0x31   : > { %v316_v62 = vadd.f32 %v653_v42, %v283_v39  ;;  %v317_v63 = vadd.f32 %v653_v42, %v284_v40  ;;  %v318_v0 = vadd.f32 %v653_v42, %v285_v41  ;;  %v319_v1 = vadd.f32 %v653_v42, %v286_v45  ;;  %v358_v40 = vld [vmem:[%s638_s6 + $0x70] sm:$0xff]  ;;  %v359_v41 = vld [vmem:[%s638_s6 + $0x78] sm:$0xff] }
  0x32   : > { %v376_v2 = vadd.f32 %v344_v43, %v312_v55  ;;  %v377_v3 = vadd.f32 %v345_v44, %v313_v56  ;;  %v378_v4 = vadd.f32 %v346_v48, %v314_v57  ;;  %v379_v5 = vadd.f32 %v347_v49, %v315_v58  ;;  %v263_v43 = vld [vmem:[%s616_s25 + $0x88] sm:$0xff]  ;;  %v264_v48 = vld [vmem:[%s616_s25 + $0x90] sm:$0xff]  ;;  %v265_v49 = vld [vmem:[%s616_s25 + $0x98] sm:$0xff] }
  0x33   : > { %v380_v6 = vadd.f32 %v348_v50, %v316_v62  ;;  %v381_v7 = vadd.f32 %v349_v59, %v317_v63  ;;  %v382_v8 = vadd.f32 %v350_v60, %v318_v0  ;;  %v684_v9 = vadd.f32 %v351_v61, %v319_v1  ;;  %v266_v50 = vld [vmem:[%s616_s25 + $0xa0] sm:$0xff]  ;;  %v267_v55 = vld [vmem:[%s616_s25 + $0xa8] sm:$0xff]  ;;  %v268_v1 = vld [vmem:[%s616_s25 + $0xb0] sm:$0xff] }
  0x34   : > { %v408_v12 = vmax.f32 %v376_v2, 0.0  ;;  %v409_v13 = vmax.f32 %v377_v3, 0.0  ;;  %v410_v14 = vmax.f32 %v378_v4, 0.0  ;;  %v411_v15 = vmax.f32 %v379_v5, 0.0  ;;  %v360_v61 = vld [vmem:[%s638_s6 + $0x80] sm:$0xff]  ;;  %v269_v2 = vld [vmem:[%s616_s25 + $0xb8] sm:$0xff] }
  0x35   : > { %v412_v18 = vmax.f32 %v380_v6, 0.0  ;;  %v413_v19 = vmax.f32 %v381_v7, 0.0  ;;  %v414_v20 = vmax.f32 %v382_v8, 0.0  ;;  %v415_v21 = vmax.f32 %v684_v9, 0.0  ;;  %v361_v5 = vld [vmem:[%s638_s6 + $0x88] sm:$0xff]  ;;  %v362_v6 = vld [vmem:[%s638_s6 + $0x90] sm:$0xff] }
  0x36   : > { %440 = vst [vmem:[%s682_s9] sm:$0xff] %v408_v12  ;;  %v320_v25 = vadd.f32 %v653_v42, %v287_v46  ;;  %v321_v26 = vadd.f32 %v653_v42, %v288_v47  ;;  %v322_v27 = vadd.f32 %v653_v42, %v289_v51  ;;  %v323_v28 = vadd.f32 %v653_v42, %v290_v52  ;;  %v363_v7 = vld [vmem:[%s638_s6 + $0x98] sm:$0xff] }
  0x37   : > { %441 = vst [vmem:[%s682_s9 + $0x8] sm:$0xff] %v409_v13  ;;  %v324_v31 = vadd.f32 %v653_v42, %v291_v53  ;;  %v325_v32 = vadd.f32 %v653_v42, %v292_v54  ;;  %v293_v33 = vmul.f32 %v629_v24, %v260_v16  ;;  %v294_v34 = vmul.f32 %v629_v24, %v261_v17 }
  0x38   : > { %442 = vst [vmem:[%s682_s9 + $0x10] sm:$0xff] %v410_v14  ;;  %v384_v36 = vadd.f32 %v352_v10, %v320_v25  ;;  %v385_v37 = vadd.f32 %v353_v11, %v321_v26  ;;  %v386_v38 = vadd.f32 %v354_v22, %v322_v27  ;;  %v387_v39 = vadd.f32 %v355_v23, %v323_v28  ;;  %v364_v14 = vld [vmem:[%s638_s6 + $0xa0] sm:$0xff]  ;;  %v366_v25 = vld [vmem:[%s638_s6 + $0xb0] sm:$0xff] }
  0x39   : > { %443 = vst [vmem:[%s682_s9 + $0x18] sm:$0xff] %v411_v15  ;;  %v388_v44 = vadd.f32 %v356_v29, %v324_v31  ;;  %v711_v45 = vadd.f32 %v357_v30, %v325_v32  ;;  %v326_v46 = vadd.f32 %v653_v42, %v293_v33  ;;  %v327_v47 = vadd.f32 %v653_v42, %v294_v34  ;;  %v365_v15 = vld [vmem:[%s638_s6 + $0xa8] sm:$0xff]  ;;  %v270_v26 = vld [vmem:[%s616_s25 + $0xc0] sm:$0xff]  ;;  %v272_v32 = vld [vmem:[%s616_s25 + $0xd0] sm:$0xff] }
  0x3a   : > { %444 = vst [vmem:[%s682_s9 + $0x20] sm:$0xff] %v412_v18  ;;  %v416_v51 = vmax.f32 %v384_v36, 0.0  ;;  %v417_v52 = vmax.f32 %v385_v37, 0.0  ;;  %v418_v53 = vmax.f32 %v386_v38, 0.0  ;;  %v419_v54 = vmax.f32 %v387_v39, 0.0  ;;  %v271_v31 = vld [vmem:[%s616_s25 + $0xc8] sm:$0xff] }
  0x3b   : > { %445 = vst [vmem:[%s682_s9 + $0x28] sm:$0xff] %v413_v19  ;;  %v420_v56 = vmax.f32 %v388_v44, 0.0  ;;  %v421_v57 = vmax.f32 %v711_v45, 0.0  ;;  %v390_v58 = vadd.f32 %v358_v40, %v326_v46  ;;  %v391_v59 = vadd.f32 %v359_v41, %v327_v47  ;;  %v273_v33 = vld [vmem:[%s616_s25 + $0xd8] sm:$0xff]  ;;  %v274_v37 = vld [vmem:[%s616_s25 + $0xe0] sm:$0xff]  ;;  %v275_v38 = vld [vmem:[%s616_s25 + $0xe8] sm:$0xff] }
  0x3c   : > { %446 = vst [vmem:[%s682_s9 + $0x30] sm:$0xff] %v414_v20  ;;  %v295_v60 = vmul.f32 %v629_v24, %v262_v35  ;;  %v296_v62 = vmul.f32 %v629_v24, %v263_v43  ;;  %v297_v63 = vmul.f32 %v629_v24, %v264_v48  ;;  %v298_v0 = vmul.f32 %v629_v24, %v265_v49  ;;  %v367_v36 = vld [vmem:[%s638_s6 + $0xb8] sm:$0xff]  ;;  %v276_v48 = vld [vmem:[%s616_s25 + $0xf0] sm:$0xff] }
  0x3d   : > { %447 = vst [vmem:[%s682_s9 + $0x38] sm:$0xff] %v415_v21  ;;  %v422_v3 = vmax.f32 %v390_v58, 0.0  ;;  %v423_v4 = vmax.f32 %v391_v59, 0.0  ;;  %v299_v8 = vmul.f32 %v629_v24, %v266_v50  ;;  %v300_v9 = vmul.f32 %v629_v24, %v267_v55  ;;  %v277_v49 = vld [vmem:[%s616_s25 + $0xf8] sm:$0xff] }
  0x3e   : > { %448 = vst [vmem:[%s682_s9 + $0x40] sm:$0xff] %v416_v51  ;;  %v328_v10 = vadd.f32 %v653_v42, %v295_v60  ;;  %v329_v11 = vadd.f32 %v653_v42, %v296_v62  ;;  %v330_v12 = vadd.f32 %v653_v42, %v297_v63  ;;  %v331_v13 = vadd.f32 %v653_v42, %v298_v0  ;;  %v372_v63 = vld [vmem:[%s638_s6 + $0xe0] sm:$0xff] }
  0x3f   : > { %449 = vst [vmem:[%s682_s9 + $0x48] sm:$0xff] %v417_v52  ;;  %v332_v16 = vadd.f32 %v653_v42, %v299_v8  ;;  %v333_v17 = vadd.f32 %v653_v42, %v300_v9  ;;  %v301_v18 = vmul.f32 %v629_v24, %v268_v1  ;;  %v302_v19 = vmul.f32 %v629_v24, %v269_v2  ;;  %v368_v52 = vld [vmem:[%s638_s6 + $0xc0] sm:$0xff] }
  0x40   : > { %450 = vst [vmem:[%s682_s9 + $0x50] sm:$0xff] %v418_v53  ;;  %v392_v20 = vadd.f32 %v360_v61, %v328_v10  ;;  %v393_v21 = vadd.f32 %v361_v5, %v329_v11  ;;  %v394_v22 = vadd.f32 %v362_v6, %v330_v12  ;;  %v395_v23 = vadd.f32 %v363_v7, %v331_v13  ;;  %v369_v53 = vld [vmem:[%s638_s6 + $0xc8] sm:$0xff]  ;;  %v371_v61 = vld [vmem:[%s638_s6 + $0xd8] sm:$0xff]  ;;  %v374_v11 = vld [vmem:[%s638_s6 + $0xf0] sm:$0xff] }
  0x41   : > { %451 = vst [vmem:[%s682_s9 + $0x58] sm:$0xff] %v419_v54  ;;  %v396_v27 = vadd.f32 %v364_v14, %v332_v16  ;;  %v397_v28 = vadd.f32 %v365_v15, %v333_v17  ;;  %v334_v29 = vadd.f32 %v653_v42, %v301_v18  ;;  %v335_v30 = vadd.f32 %v653_v42, %v302_v19  ;;  %v370_v54 = vld [vmem:[%s638_s6 + $0xd0] sm:$0xff]  ;;  %v373_v7 = vld [vmem:[%s638_s6 + $0xe8] sm:$0xff]  ;;  %v375_v14 = vld [vmem:[%s638_s6 + $0xf8] sm:$0xff] }
  0x42   : > { %452 = vst [vmem:[%s682_s9 + $0x60] sm:$0xff] %v420_v56  ;;  %v424_v34 = vmax.f32 %v392_v20, 0.0  ;;  %v425_v35 = vmax.f32 %v393_v21, 0.0  ;;  %v426_v39 = vmax.f32 %v394_v22, 0.0  ;;  %v427_v40 = vmax.f32 %v395_v23, 0.0 }
  0x43   : > { %453 = vst [vmem:[%s682_s9 + $0x68] sm:$0xff] %v421_v57  ;;  %v428_v41 = vmax.f32 %v396_v27, 0.0  ;;  %v398_v43 = vadd.f32 %v366_v25, %v334_v29  ;;  %v303_v44 = vmul.f32 %v629_v24, %v270_v26  ;;  %v304_v45 = vmul.f32 %v629_v24, %v271_v31 }
  0x44   : > { %454 = vst [vmem:[%s682_s9 + $0x70] sm:$0xff] %v422_v3  ;;  %v305_v46 = vmul.f32 %v629_v24, %v272_v32  ;;  %v306_v47 = vmul.f32 %v629_v24, %v273_v33  ;;  %v429_v50 = vmax.f32 %v397_v28, 0.0  ;;  %v399_v51 = vadd.f32 %v367_v36, %v335_v30 }
  0x45   : > { %455 = vst [vmem:[%s682_s9 + $0x78] sm:$0xff] %v423_v4  ;;  %v307_v55 = vmul.f32 %v629_v24, %v274_v37  ;;  %v308_v56 = vmul.f32 %v629_v24, %v275_v38  ;;  %v336_v57 = vadd.f32 %v653_v42, %v303_v44  ;;  %v337_v58 = vadd.f32 %v653_v42, %v304_v45 }
  0x46   : > { %456 = vst [vmem:[%s682_s9 + $0x80] sm:$0xff] %v424_v34  ;;  %v338_v59 = vadd.f32 %v653_v42, %v305_v46  ;;  %v339_v60 = vadd.f32 %v653_v42, %v306_v47  ;;  %v309_v1 = vmul.f32 %v629_v24, %v276_v48  ;;  %v310_v2 = vmul.f32 %v629_v24, %v277_v49 }
  0x47   : > { %457 = vst [vmem:[%s682_s9 + $0x88] sm:$0xff] %v425_v35  ;;  %v340_v62 = vadd.f32 %v653_v42, %v307_v55  ;;  %v341_v0 = vadd.f32 %v653_v42, %v308_v56  ;;  %v430_v3 = vmax.f32 %v398_v43, 0.0  ;;  %v400_v4 = vadd.f32 %v368_v52, %v336_v57 }
  0x48   : > { %458 = vst [vmem:[%s682_s9 + $0x90] sm:$0xff] %v426_v39  ;;  %v401_v5 = vadd.f32 %v369_v53, %v337_v58  ;;  %v402_v6 = vadd.f32 %v370_v54, %v338_v59  ;;  %v431_v8 = vmax.f32 %v399_v51, 0.0  ;;  %v403_v9 = vadd.f32 %v371_v61, %v339_v60 }
  0x49   : > { %459 = vst [vmem:[%s682_s9 + $0x98] sm:$0xff] %v427_v40  ;;  %v342_v10 = vadd.f32 %v653_v42, %v309_v1  ;;  %v343_v12 = vadd.f32 %v653_v42, %v310_v2  ;;  %v432_v24 = vmax.f32 %v400_v4, 0.0  ;;  %v404_v13 = vadd.f32 %v372_v63, %v340_v62 }
  0x4a   : > { %460 = vst [vmem:[%s682_s9 + $0xa0] sm:$0xff] %v428_v41  ;;  %v433_v15 = vmax.f32 %v401_v5, 0.0  ;;  %v405_v16 = vadd.f32 %v373_v7, %v341_v0  ;;  %v434_v17 = vmax.f32 %v402_v6, 0.0  ;;  %v435_v19 = vmax.f32 %v403_v9, 0.0 }
  0x4b   : > { %461 = vst [vmem:[%s682_s9 + $0xa8] sm:$0xff] %v429_v50  ;;  %v406_v18 = vadd.f32 %v374_v11, %v342_v10  ;;  %v407_v42 = vadd.f32 %v375_v14, %v343_v12  ;;  %v436_v20 = vmax.f32 %v404_v13, 0.0 }
  0x4c   : > { %462 = vst [vmem:[%s682_s9 + $0xb0] sm:$0xff] %v430_v3  ;;  %v437_v21 = vmax.f32 %v405_v16, 0.0 }
  0x4d   : > { %463 = vst [vmem:[%s682_s9 + $0xb8] sm:$0xff] %v431_v8  ;;  %v438_v22 = vmax.f32 %v406_v18, 0.0  ;;  %v439_v23 = vmax.f32 %v407_v42, 0.0 }
  0x4e   : > { %464 = vst [vmem:[%s682_s9 + $0xc0] sm:$0xff] %v432_v24 }
  0x4f   : > { %465 = vst [vmem:[%s682_s9 + $0xc8] sm:$0xff] %v433_v15 }
  0x50   : > { %466 = vst [vmem:[%s682_s9 + $0xd0] sm:$0xff] %v434_v17 }
  0x51   : > { %467 = vst [vmem:[%s682_s9 + $0xd8] sm:$0xff] %v435_v19 }
  0x52   : > { %468 = vst [vmem:[%s682_s9 + $0xe0] sm:$0xff] %v436_v20 }
  0x53   : > { %469 = vst [vmem:[%s682_s9 + $0xe8] sm:$0xff] %v437_v21 }
  0x54   : > { %470 = vst [vmem:[%s682_s9 + $0xf0] sm:$0xff] %v438_v22 }
  0x55   : > { %471 = vst [vmem:[%s682_s9 + $0xf8] sm:$0xff] %v439_v23 }
  0x56 PF: > { %s14_s15 = sadd.s32 1, %s569_s15  }
  0x57   : > { %p11_p4 = scmp.ge.s32.totalorder %s14_s15, 4  }
  0x59   :  { %13 = sbr.rel (!%p11_p4) target bundleno = 1 (0x1), region = 69 }

// kernel: basic_block.5
= control target key start
LH: loop header
LB: loop body
LE: loop exit
PB: predicated region body
PF: predicated region fallthrough
CT: control target
= control target key end

     0   :  { %s464_s12 = smov 0   ;;  %s636_s0 = inlined_call_operand.vmem [shape: f32[512,128], index: 0, kind: input, shape index: {}]   ;;  %s637_s1 = inlined_call_operand.vmem [shape: f32[8,128], index: 1, kind: input, shape index: {}]   ;;  %s638_s2 = inlined_call_operand.vmem [shape: f32[8,128], index: 2, kind: input, shape index: {}]   ;;  %s639_s3 = inlined_call_operand.vmem [shape: f32[512,128], index: 3, kind: output, shape index: {}]  }
   0x1 LB: > { %s415_s13 = sadd.s32 4294967295, %s442_s12   ;;  %p419_p0 = scmp.ge.s32.totalorder %s442_s12, 1  ;;  %s442_s12 = sphi %s464_s12, %s13_s12  }
   0x2   : > { %p138_p1 = scmp.lt.s32.totalorder %s442_s12, 3 }
   0x4   : > { %p139_p2 = pnand %p419_p0, %p138_p1 }
   0x5   : > { %s420_s18 = sshll.u32 (!%p139_p2), %s415_s13, 5 }
   0x6   : > { %142 = sbr.rel (%p139_p2) target bundleno = 84 (0x54), region = 32  ;;  %p163_p3 = scmp.lt.s32.totalorder (!%p139_p2), %s420_s18, 63 }
   0xb   : > { %v174_v0 = vld [vmem:[%s637_s1] sm:$0x1]  ;;  %v176_v1 = vld [vmem:[%s637_s1 + $0x1] sm:$0x1]  ;;  %s641_s18 = smov (!%p163_p3, %s420_s18), 63 }
   0xc   : > { %v175_v2 = vmul.f32 0.001953125, %v174_v0  ;;  %v177_v3 = vmul.f32 0.001953125, %v176_v1  ;;  %s421_s19 = sshll.u32 %s641_s18, 3  ;;  %v181_v13 = vld [vmem:[%s638_s2] sm:$0x1] }
   0xd   : > { %s489_s24 = scalar_lea.vmem %s636_s0, %s421_s19  ;;  %v194_v17 = vld [vmem:[%s638_s2 + $0x1] sm:$0x1]  ;;  %s528_s29 = scalar_lea.vmem %s639_s3, %s421_s19 }
   0xe   : > { %v178_v4 = vmul.f32 %v175_v2, %v175_v2  ;;  %v197_v18 = vld [vmem:[%s489_s24] sm:$0xff]  ;;  %v198_v19 = vld [vmem:[%s489_s24 + $0x8] sm:$0xff]  ;;  %v199_v20 = vld [vmem:[%s489_s24 + $0x10] sm:$0xff] }
   0xf   : > { %v200_v23 = vld [vmem:[%s489_s24 + $0x18] sm:$0xff]  ;;  %v201_v24 = vld [vmem:[%s489_s24 + $0x20] sm:$0xff]  ;;  %v202_v25 = vld [vmem:[%s489_s24 + $0x28] sm:$0xff] }
  0x10   : > { %v179_v5 = vsub.f32 %v177_v3, %v178_v4  ;;  %v203_v26 = vld [vmem:[%s489_s24 + $0x30] sm:$0xff]  ;;  %v204_v31 = vld [vmem:[%s489_s24 + $0x38] sm:$0xff]  ;;  %v205_v32 = vld [vmem:[%s489_s24 + $0x40] sm:$0xff] }
  0x11   : > { %v206_v38 = vld [vmem:[%s489_s24 + $0x48] sm:$0xff]  ;;  %v207_v39 = vld [vmem:[%s489_s24 + $0x50] sm:$0xff]  ;;  %v208_v46 = vld [vmem:[%s489_s24 + $0x58] sm:$0xff] }
  0x12   : > { %v180_v6 = vmax.f32 %v179_v5, 0.0  ;;  %v209_v51 = vld [vmem:[%s489_s24 + $0x60] sm:$0xff]  ;;  %v210_v56 = vld [vmem:[%s489_s24 + $0x68] sm:$0xff]  ;;  %v211_v60 = vld [vmem:[%s489_s24 + $0x70] sm:$0xff] }
  0x13   : > { %v212_v0 = vld [vmem:[%s489_s24 + $0x78] sm:$0xff]  ;;  %v213_v4 = vld [vmem:[%s489_s24 + $0x80] sm:$0xff] }
  0x14   : > { %v182_v7 = vadd.f32 1e-05, %v180_v6 }
  0x16   : > { %434 = vrsqrt.f32 %v182_v7  ;;  %vm189_vm0 = vweird.f32 %v182_v7 }
  0x1c   : > { %v435_v8 = vpop.eup %434 }
  0x1d   : > { %v184_v9 = vmul.f32 %v435_v8, %v182_v7  ;;  %vm190_vm1 = vweird.f32 %v435_v8 }
  0x1e   : > { %vm191_vm2 = vmor %vm189_vm0, %vm190_vm1 }
  0x1f   : > { %v185_v10 = vmul.f32 %v435_v8, %v184_v9 }
  0x21   : > { %v186_v11 = vmul.f32 0.5, %v185_v10 }
  0x23   : > { %v187_v12 = vsub.f32 1.5, %v186_v11 }
  0x25   : > { %v188_v14 = vmul.f32 %v435_v8, %v187_v12  ;;  %v215_v12 = vld [vmem:[%s489_s24 + $0x90] sm:$0xff] }
  0x27   : > { %v192_v15 = vsel %vm191_vm2, %v435_v8, %v188_v14  ;;  %v214_v8 = vld [vmem:[%s489_s24 + $0x88] sm:$0xff] }
  0x28   : > { %v193_v16 = vmul.f32 %v192_v15, %v181_v13 }
  0x2a   : > { %v195_v21 = vmul.f32 %v193_v16, %v175_v2  ;;  %v497_v22 = vperm.slane %v193_v16, 0  ;;  %v216_v16 = vld [vmem:[%s489_s24 + $0x98] sm:$0xff] }
  0x2c   : > { %v196_v27 = vsub.f32 %v194_v17, %v195_v21  ;;  %v230_v28 = vmul.f32 %v497_v22, %v197_v18  ;;  %v231_v29 = vmul.f32 %v497_v22, %v198_v19  ;;  %v232_v30 = vmul.f32 %v497_v22, %v199_v20  ;;  %v217_v20 = vld [vmem:[%s489_s24 + $0xa0] sm:$0xff] }
  0x2d   : > { %v233_v33 = vmul.f32 %v497_v22, %v200_v23  ;;  %v234_v34 = vmul.f32 %v497_v22, %v201_v24  ;;  %v235_v35 = vmul.f32 %v497_v22, %v202_v25  ;;  %v236_v37 = vmul.f32 %v497_v22, %v203_v26  ;;  %v218_v25 = vld [vmem:[%s489_s24 + $0xa8] sm:$0xff] }
  0x2e   : > { %v511_v36 = vperm.slane %v196_v27, 0  ;;  %v237_v40 = vmul.f32 %v497_v22, %v204_v31  ;;  %v238_v41 = vmul.f32 %v497_v22, %v205_v32  ;;  %v239_v49 = vmul.f32 %v497_v22, %v206_v38  ;;  %v221_v38 = vld [vmem:[%s489_s24 + $0xc0] sm:$0xff] }
  0x2f   : > { %v240_v50 = vmul.f32 %v497_v22, %v207_v39  ;;  %v241_v59 = vmul.f32 %v497_v22, %v208_v46  ;;  %v242_v63 = vmul.f32 %v497_v22, %v209_v51  ;;  %v243_v3 = vmul.f32 %v497_v22, %v210_v56  ;;  %v223_v46 = vld [vmem:[%s489_s24 + $0xd0] sm:$0xff] }
  0x30   : > { %v263_v42 = vadd.f32 %v511_v36, %v230_v28  ;;  %v264_v43 = vadd.f32 %v511_v36, %v231_v29  ;;  %v265_v44 = vadd.f32 %v511_v36, %v232_v30  ;;  %v266_v45 = vadd.f32 %v511_v36, %v233_v33  ;;  %v219_v29 = vld [vmem:[%s489_s24 + $0xb0] sm:$0xff]  ;;  %v220_v33 = vld [vmem:[%s489_s24 + $0xb8] sm:$0xff] }
  0x31   : > { %v267_v47 = vadd.f32 %v511_v36, %v234_v34  ;;  %v268_v48 = vadd.f32 %v511_v36, %v235_v35  ;;  %v269_v55 = vadd.f32 %v511_v36, %v236_v37  ;;  %v270_v58 = vadd.f32 %v511_v36, %v237_v40 }
  0x32   : > { %v295_v52 = vmax.f32 %v263_v42, 0.0  ;;  %v296_v53 = vmax.f32 %v264_v43, 0.0  ;;  %v297_v54 = vmax.f32 %v265_v44, 0.0  ;;  %v298_v57 = vmax.f32 %v266_v45, 0.0  ;;  %v222_v42 = vld [vmem:[%s489_s24 + $0xc8] sm:$0xff] }
  0x33   : > { %v299_v61 = vmax.f32 %v267_v47, 0.0  ;;  %v271_v62 = vadd.f32 %v511_v36, %v238_v41  ;;  %v300_v1 = vmax.f32 %v268_v48, 0.0  ;;  %v272_v2 = vadd.f32 %v511_v36, %v239_v49 }
  0x34   : > { %327 = vst [vmem:[%s528_s29] sm:$0xff] %v295_v52  ;;  %v301_v5 = vmax.f32 %v269_v55, 0.0  ;;  %v273_v6 = vadd.f32 %v511_v36, %v240_v50  ;;  %v244_v7 = vmul.f32 %v497_v22, %v211_v60  ;;  %v302_v9 = vmax.f32 %v270_v58, 0.0  ;;  %v224_v50 = vld [vmem:[%s489_s24 + $0xd8] sm:$0xff]  ;;  %v226_v58 = vld [vmem:[%s489_s24 + $0xe8] sm:$0xff] }
  0x35   : > { %328 = vst [vmem:[%s528_s29 + $0x8] sm:$0xff] %v296_v53  ;;  %v274_v10 = vadd.f32 %v511_v36, %v241_v59  ;;  %v245_v11 = vmul.f32 %v497_v22, %v212_v0  ;;  %v303_v13 = vmax.f32 %v271_v62, 0.0  ;;  %v275_v14 = vadd.f32 %v511_v36, %v242_v63  ;;  %v227_v62 = vld [vmem:[%s489_s24 + $0xf0] sm:$0xff] }
  0x36   : > { %329 = vst [vmem:[%s528_s29 + $0x10] sm:$0xff] %v297_v54  ;;  %v246_v15 = vmul.f32 %v497_v22, %v213_v4  ;;  %v304_v17 = vmax.f32 %v272_v2, 0.0  ;;  %v276_v18 = vadd.f32 %v511_v36, %v243_v3  ;;  %v247_v19 = vmul.f32 %v497_v22, %v214_v8  ;;  %v225_v54 = vld [vmem:[%s489_s24 + $0xe0] sm:$0xff]  ;;  %v228_v2 = vld [vmem:[%s489_s24 + $0xf8] sm:$0xff] }
  0x37   : > { %330 = vst [vmem:[%s528_s29 + $0x18] sm:$0xff] %v298_v57  ;;  %v305_v21 = vmax.f32 %v273_v6, 0.0  ;;  %v277_v23 = vadd.f32 %v511_v36, %v244_v7  ;;  %v248_v24 = vmul.f32 %v497_v22, %v215_v12  ;;  %v306_v26 = vmax.f32 %v274_v10, 0.0 }
  0x38   : > { %331 = vst [vmem:[%s528_s29 + $0x20] sm:$0xff] %v299_v61  ;;  %v278_v27 = vadd.f32 %v511_v36, %v245_v11  ;;  %v249_v28 = vmul.f32 %v497_v22, %v216_v16  ;;  %v307_v30 = vmax.f32 %v275_v14, 0.0  ;;  %v279_v31 = vadd.f32 %v511_v36, %v246_v15 }
  0x39   : > { %332 = vst [vmem:[%s528_s29 + $0x28] sm:$0xff] %v300_v1  ;;  %v250_v32 = vmul.f32 %v497_v22, %v217_v20  ;;  %v308_v34 = vmax.f32 %v276_v18, 0.0  ;;  %v280_v35 = vadd.f32 %v511_v36, %v247_v19  ;;  %v251_v37 = vmul.f32 %v497_v22, %v218_v25 }
  0x3a   : > { %333 = vst [vmem:[%s528_s29 + $0x30] sm:$0xff] %v301_v5  ;;  %v309_v39 = vmax.f32 %v277_v23, 0.0  ;;  %v281_v40 = vadd.f32 %v511_v36, %v248_v24  ;;  %v252_v41 = vmul.f32 %v497_v22, %v219_v29  ;;  %v310_v43 = vmax.f32 %v278_v27, 0.0 }
  0x3b   : > { %334 = vst [vmem:[%s528_s29 + $0x38] sm:$0xff] %v302_v9  ;;  %v282_v44 = vadd.f32 %v511_v36, %v249_v28  ;;  %v253_v45 = vmul.f32 %v497_v22, %v220_v33  ;;  %v311_v47 = vmax.f32 %v279_v31, 0.0  ;;  %v283_v48 = vadd.f32 %v511_v36, %v250_v32 }
  0x3c   : > { %335 = vst [vmem:[%s528_s29 + $0x40] sm:$0xff] %v303_v13  ;;  %v254_v49 = vmul.f32 %v497_v22, %v221_v38  ;;  %v312_v51 = vmax.f32 %v280_v35, 0.0  ;;  %v284_v52 = vadd.f32 %v511_v36, %v251_v37  ;;  %v255_v53 = vmul.f32 %v497_v22, %v222_v42 }
  0x3d   : > { %336 = vst [vmem:[%s528_s29 + $0x48] sm:$0xff] %v304_v17  ;;  %v313_v55 = vmax.f32 %v281_v40, 0.0  ;;  %v285_v56 = vadd.f32 %v511_v36, %v252_v41  ;;  %v256_v57 = vmul.f32 %v497_v22, %v223_v46  ;;  %v314_v59 = vmax.f32 %v282_v44, 0.0 }
  0x3e   : > { %337 = vst [vmem:[%s528_s29 + $0x50] sm:$0xff] %v305_v21  ;;  %v286_v60 = vadd.f32 %v511_v36, %v253_v45  ;;  %v257_v61 = vmul.f32 %v497_v22, %v224_v50  ;;  %v315_v63 = vmax.f32 %v283_v48, 0.0  ;;  %v287_v0 = vadd.f32 %v511_v36, %v254_v49 }
  0x3f   : > { %338 = vst [vmem:[%s528_s29 + $0x58] sm:$0xff] %v306_v26  ;;  %v258_v1 = vmul.f32 %v497_v22, %v225_v54  ;;  %v316_v3 = vmax.f32 %v284_v52, 0.0  ;;  %v288_v4 = vadd.f32 %v511_v36, %v255_v53  ;;  %v259_v5 = vmul.f32 %v497_v22, %v226_v58 }
  0x40   : > { %339 = vst [vmem:[%s528_s29 + $0x60] sm:$0xff] %v307_v30  ;;  %v317_v6 = vmax.f32 %v285_v56, 0.0  ;;  %v289_v7 = vadd.f32 %v511_v36, %v256_v57  ;;  %v260_v8 = vmul.f32 %v497_v22, %v227_v62  ;;  %v318_v9 = vmax.f32 %v286_v60, 0.0 }
  0x41   : > { %340 = vst [vmem:[%s528_s29 + $0x68] sm:$0xff] %v308_v34  ;;  %v290_v10 = vadd.f32 %v511_v36, %v257_v61  ;;  %v261_v11 = vmul.f32 %v497_v22, %v228_v2  ;;  %v319_v12 = vmax.f32 %v287_v0, 0.0  ;;  %v291_v13 = vadd.f32 %v511_v36, %v258_v1 }
  0x42   : > { %341 = vst [vmem:[%s528_s29 + $0x70] sm:$0xff] %v309_v39  ;;  %v320_v14 = vmax.f32 %v288_v4, 0.0  ;;  %v292_v15 = vadd.f32 %v511_v36, %v259_v5  ;;  %v321_v16 = vmax.f32 %v289_v7, 0.0  ;;  %v293_v17 = vadd.f32 %v511_v36, %v260_v8 }
  0x43   : > { %342 = vst [vmem:[%s528_s29 + $0x78] sm:$0xff] %v310_v43  ;;  %v322_v22 = vmax.f32 %v290_v10, 0.0  ;;  %v294_v18 = vadd.f32 %v511_v36, %v261_v11  ;;  %v323_v19 = vmax.f32 %v291_v13, 0.0 }
  0x44   : > { %343 = vst [vmem:[%s528_s29 + $0x80] sm:$0xff] %v311_v47  ;;  %v324_v20 = vmax.f32 %v292_v15, 0.0  ;;  %v325_v21 = vmax.f32 %v293_v17, 0.0 }
  0x45   : > { %344 = vst [vmem:[%s528_s29 + $0x88] sm:$0xff] %v312_v51  ;;  %v326_v23 = vmax.f32 %v294_v18, 0.0 }
  0x46   : > { %345 = vst [vmem:[%s528_s29 + $0x90] sm:$0xff] %v313_v55 }
  0x47   : > { %346 = vst [vmem:[%s528_s29 + $0x98] sm:$0xff] %v314_v59 }
  0x48   : > { %347 = vst [vmem:[%s528_s29 + $0xa0] sm:$0xff] %v315_v63 }
  0x49   : > { %348 = vst [vmem:[%s528_s29 + $0xa8] sm:$0xff] %v316_v3 }
  0x4a   : > { %349 = vst [vmem:[%s528_s29 + $0xb0] sm:$0xff] %v317_v6 }
  0x4b   : > { %350 = vst [vmem:[%s528_s29 + $0xb8] sm:$0xff] %v318_v9 }
  0x4c   : > { %351 = vst [vmem:[%s528_s29 + $0xc0] sm:$0xff] %v319_v12 }
  0x4d   : > { %352 = vst [vmem:[%s528_s29 + $0xc8] sm:$0xff] %v320_v14 }
  0x4e   : > { %353 = vst [vmem:[%s528_s29 + $0xd0] sm:$0xff] %v321_v16 }
  0x4f   : > { %354 = vst [vmem:[%s528_s29 + $0xd8] sm:$0xff] %v322_v22 }
  0x50   : > { %355 = vst [vmem:[%s528_s29 + $0xe0] sm:$0xff] %v323_v19 }
  0x51   : > { %356 = vst [vmem:[%s528_s29 + $0xe8] sm:$0xff] %v324_v20 }
  0x52   : > { %357 = vst [vmem:[%s528_s29 + $0xf0] sm:$0xff] %v325_v21 }
  0x53   : > { %358 = vst [vmem:[%s528_s29 + $0xf8] sm:$0xff] %v326_v23 }
  0x54 PF: > { %s13_s12 = sadd.s32 1, %s442_s12  }
  0x55   : > { %p10_p4 = scmp.ge.s32.totalorder %s13_s12, 4  }
  0x57   :  { %12 = sbr.rel (!%p10_p4) target bundleno = 1 (0x1), region = 62 }

</bundles_post_ra>
